<compile_context>
chip_gen: v7x
topology: tpu7x:2x2x1
jax: 0.10.0
libtpu: 0.0.40
codegen_flags: <defaults>
</compile_context>

<pallas_src>
import functools

import numpy as np

import jax
import jax.numpy as jnp
from jax import lax
from jax.experimental import pallas as pl
from jax.experimental.pallas import tpu as pltpu


_LANE = 128
_VMEM_LIMIT = 32 * 1024 * 1024   # explicit scoped-VMEM budget (raises v5e's 16 MiB default)


# -----------------------------------------------------------------------------
# Pallas kernels
# -----------------------------------------------------------------------------
def _sa1_kernel(g_ref, w1_ref, b1_ref, w2_ref, b2_ref, w3_ref, b3_ref, o_ref,
                *, nsample):
    """SA1 shared MLP (3 -> 64 -> 64 -> 128, hidden dims zero-padded to 128) +
    max-pool over the K neighbors.

    g_ref: [tile_m, pad(3*K)] f32, packed x|y|z major (zero lane padding).
    Layer 1 (Cin=3) runs as 3 VPU broadcast FMAs; layers 2/3 are bf16 MXU
    matmuls with f32 accumulation.
    """
    tm = g_ref.shape[0]
    k = nsample
    g = g_ref[...]                                       # [tm, pad(3K)] f32
    w1 = w1_ref[...]                                     # [3, 128] f32 (cols 64.. zero)
    b1 = b1_ref[...]                                     # [1, 128]
    h = (g[:, 0 * k:1 * k, None] * w1[0]
         + g[:, 1 * k:2 * k, None] * w1[1]
         + g[:, 2 * k:3 * k, None] * w1[2] + b1)         # [tm, K, 128]
    h = jnp.maximum(h, 0.0)
    c1 = w2_ref.shape[0]
    h = h.reshape(tm * k, c1).astype(jnp.bfloat16)
    # TODO(synk): on v6e/v7x do bias+ReLU in bf16 (2x VALU rate); keep f32 on v5e.
    h = jnp.maximum(
        jnp.dot(h, w2_ref[...], preferred_element_type=jnp.float32) + b2_ref[...],
        0.0).astype(jnp.bfloat16)
    h = jnp.maximum(
        jnp.dot(h, w3_ref[...], preferred_element_type=jnp.float32) + b3_ref[...],
        0.0)
    cout = o_ref.shape[-1]
    o_ref[...] = jnp.max(h.reshape(tm, k, cout), axis=1)


def _sa2_vp_kernel(idx_ref, gx_ref, f1_ref,
                   w1x_ref, w1f_ref, b1_ref, w2_ref, b2_ref, w3_ref, b3_ref,
                   vw1_ref, vb1_ref, vw2_ref, vb2_ref, vw3_ref, vb3_ref,
                   f2_ref, vs_ref, gbuf_ref, acc_ref, *, nsample):
    """Fused SA2 shared-MLP + max-pool + ApproachNet 1x1-Conv1d stack with an
    in-kernel neighbor gather.

    idx_ref: [M*K] int32 in SMEM (scalar-prefetched flat row indices into f1).
    gx_ref : [tile_m, pad(3*K)] f32 grouped relative xyz (x|y|z major).
    f1_ref : [M1, 128] f32 SA1 features, VMEM-resident (constant block index).
    The per-neighbor loop keeps a running max into acc_ref, so no [tile_m*K, C]
    intermediates are ever materialized.
    """
    tm = gx_ref.shape[0]
    k = nsample
    base = pl.program_id(0) * tm
    gx = gx_ref[...]                                     # [tm, pad(3K)] f32
    w1x = w1x_ref[...]                                   # [3, 128] f32
    b1 = b1_ref[...]                                     # [1, 128]

    # TODO(synk): at production nsample (32/64), convert this unrolled loop into
    #             a pl.loop over >=128-row neighbor chunks.
    for kk in range(k):
        # ---- Gather neighbor kk's f1 rows from the VMEM-resident f1 block.
        # TODO(synk): replace the per-row copy loop with a batched DMA gather at
        #             production tile sizes (scalar-slot bound otherwise).
        def gather_row(r, carry, kk=kk):
            gi = idx_ref[(base + r) * k + kk]
            gbuf_ref[pl.ds(r, 1), :] = f1_ref[pl.ds(gi, 1), :]
            return carry
        lax.fori_loop(0, tm, gather_row, 0)

        feat = gbuf_ref[...].astype(jnp.bfloat16)        # [tm, 128]
        h = jnp.dot(feat, w1f_ref[...], preferred_element_type=jnp.float32)
        # xyz contribution of neighbor kk (Cin=3 -> VPU broadcast FMAs).
        hx = (gx[:, kk:kk + 1] * w1x[0][None, :]
              + gx[:, k + kk:k + kk + 1] * w1x[1][None, :]
              + gx[:, 2 * k + kk:2 * k + kk + 1] * w1x[2][None, :])
        # TODO(synk): on v6e/v7x do bias+ReLU in bf16; keep f32 on v5e.
        h = jnp.maximum(h + hx + b1, 0.0).astype(jnp.bfloat16)
        h = jnp.maximum(
            jnp.dot(h, w2_ref[...], preferred_element_type=jnp.float32) + b2_ref[...],
            0.0).astype(jnp.bfloat16)
        h = jnp.maximum(
            jnp.dot(h, w3_ref[...], preferred_element_type=jnp.float32) + b3_ref[...],
            0.0)                                         # [tm, 256] f32
        if kk == 0:
            acc_ref[...] = h
        else:
            acc_ref[...] = jnp.maximum(acc_ref[...], h)

    f2b = acc_ref[...].astype(jnp.bfloat16)              # [tm, 256]
    f2_ref[...] = f2b

    # ---- ApproachNet: conv1+bn+relu, conv2+bn+relu, conv3 (view dim padded).
    v = jnp.maximum(
        jnp.dot(f2b, vw1_ref[...], preferred_element_type=jnp.float32) + vb1_ref[...],
        0.0).astype(jnp.bfloat16)
    v = jnp.maximum(
        jnp.dot(v, vw2_ref[...], preferred_element_type=jnp.float32) + vb2_ref[...],
        0.0).astype(jnp.bfloat16)
    vs_ref[...] = (jnp.dot(v, vw3_ref[...], preferred_element_type=jnp.float32)
                   + vb3_ref[...])


# TODO(synk): invariant weights could use pipeline_mode=pl.Buffered(1) (or a
#             one-time DMA into scratch) to drop their redundant double buffer;
#             left as default double-buffering here to keep lowering simple.
def _const_spec_sa1(arr):
    nd = arr.ndim
    return pl.BlockSpec(arr.shape, lambda i: (0,) * nd)


def _const_spec_sa2(arr):
    nd = arr.ndim
    return pl.BlockSpec(arr.shape, lambda i, idx: (0,) * nd)


def sa1_pointnet(g1, wp, *, tile_m, nsample):
    """g1: [M, pad(3*K)] f32 packed relative coords -> [M, 128] f32 features."""
    m, gcols = g1.shape
    cout = wp["sa1_w3"].shape[1]
    assert m % tile_m == 0
    kern = functools.partial(_sa1_kernel, nsample=nsample)
    return pl.pallas_call(
        kern,
        out_shape=jax.ShapeDtypeStruct((m, cout), jnp.float32),
        grid_spec=pltpu.PrefetchScalarGridSpec(
            num_scalar_prefetch=0,
            grid=(m // tile_m,),
            in_specs=[
                pl.BlockSpec((tile_m, gcols), lambda i: (i, 0)),
                _const_spec_sa1(wp["sa1_w1"]), _const_spec_sa1(wp["sa1_b1"]),
                _const_spec_sa1(wp["sa1_w2"]), _const_spec_sa1(wp["sa1_b2"]),
                _const_spec_sa1(wp["sa1_w3"]), _const_spec_sa1(wp["sa1_b3"]),
            ],
            out_specs=pl.BlockSpec((tile_m, cout), lambda i: (i, 0)),
        ),
        compiler_params=pltpu.CompilerParams(
            dimension_semantics=("parallel",),
            vmem_limit_bytes=_VMEM_LIMIT),
    )(g1, wp["sa1_w1"], wp["sa1_b1"], wp["sa1_w2"], wp["sa1_b2"],
      wp["sa1_w3"], wp["sa1_b3"])


def sa2_approach(flat_idx, g2_xyz, f1, wp, *, tile_m, nsample):
    """Fused SA2 + ApproachNet MLP with in-kernel gather of f1 neighbor rows.

    flat_idx: [M*K] int32 (SMEM scalar prefetch), g2_xyz: [M, pad(3*K)] f32,
    f1: [M1, 128] f32 -> (f2 [M,256] bf16, view scores [M, Vpad] f32).
    """
    m, gcols = g2_xyz.shape
    m1, cf = f1.shape
    assert flat_idx.shape == (m * nsample,)
    assert m % tile_m == 0
    c3 = wp["sa2_w3"].shape[1]
    vpad = wp["vp_w3"].shape[1]
    kern = functools.partial(_sa2_vp_kernel, nsample=nsample)
    return pl.pallas_call(
        kern,
        out_shape=(jax.ShapeDtypeStruct((m, c3), jnp.bfloat16),
                   jax.ShapeDtypeStruct((m, vpad), jnp.float32)),
        grid_spec=pltpu.PrefetchScalarGridSpec(
            num_scalar_prefetch=1,
            grid=(m // tile_m,),
            in_specs=[
                pl.BlockSpec((tile_m, gcols), lambda i, idx: (i, 0)),
                # f1 is small (<=2 MiB at production): constant block index keeps
                # it VMEM-resident across grid steps (no re-DMA).
                pl.BlockSpec((m1, cf), lambda i, idx: (0, 0)),
                _const_spec_sa2(wp["sa2_w1x"]), _const_spec_sa2(wp["sa2_w1f"]),
                _const_spec_sa2(wp["sa2_b1"]),
                _const_spec_sa2(wp["sa2_w2"]), _const_spec_sa2(wp["sa2_b2"]),
                _const_spec_sa2(wp["sa2_w3"]), _const_spec_sa2(wp["sa2_b3"]),
                _const_spec_sa2(wp["vp_w1"]), _const_spec_sa2(wp["vp_b1"]),
                _const_spec_sa2(wp["vp_w2"]), _const_spec_sa2(wp["vp_b2"]),
                _const_spec_sa2(wp["vp_w3"]), _const_spec_sa2(wp["vp_b3"]),
            ],
            out_specs=[pl.BlockSpec((tile_m, c3), lambda i, idx: (i, 0)),
                       pl.BlockSpec((tile_m, vpad), lambda i, idx: (i, 0))],
            scratch_shapes=[pltpu.VMEM((tile_m, cf), jnp.float32),
                            pltpu.VMEM((tile_m, c3), jnp.float32)],
        ),
        compiler_params=pltpu.CompilerParams(
            dimension_semantics=("parallel",),
            vmem_limit_bytes=_VMEM_LIMIT),
    )(flat_idx, g2_xyz, f1,
      wp["sa2_w1x"], wp["sa2_w1f"], wp["sa2_b1"],
      wp["sa2_w2"], wp["sa2_b2"], wp["sa2_w3"], wp["sa2_b3"],
      wp["vp_w1"], wp["vp_b1"], wp["vp_w2"], wp["vp_b2"],
      wp["vp_w3"], wp["vp_b3"])


# -----------------------------------------------------------------------------
# JAX glue: grouping, backbone, ApproachNet tail
# -----------------------------------------------------------------------------
def knn_group(xyz, new_xyz, k):
    """xyz [B,N,3], new_xyz [B,S,3] -> (relative grouped xyz [B,S,K,3], idx [B,S,K])."""
    # TODO(synk): at production N (~20k) tile this distance + top_k into Pallas.
    d2 = jnp.sum((new_xyz[:, :, None, :] - xyz[:, None, :, :]) ** 2, axis=-1)
    _, idx = jax.lax.top_k(-d2, k)                                   # [B,S,K]
    gather = jax.vmap(lambda src, ind: src[ind])
    grouped_xyz = gather(xyz, idx) - new_xyz[:, :, None, :]          # relative
    return grouped_xyz, idx


def _pack_coords(grouped_xyz, lane_multiple=_LANE):
    """[B, S, K, 3] -> [B*S, pad(3*K)] (x|y|z major, zero lane padding)."""
    b, s, k, _ = grouped_xyz.shape
    flat = jnp.transpose(grouped_xyz, (0, 1, 3, 2)).reshape(b * s, 3 * k)
    pad = (-(3 * k)) % lane_multiple
    if pad:
        flat = jnp.pad(flat, ((0, 0), (0, pad)))
    return flat


def generate_grasp_views(n, phi=(np.sqrt(5) - 1) / 2, r=1.0):
    i = np.arange(n, dtype=np.float64)
    zi = (2 * i + 1) / n - 1
    xi = np.sqrt(np.maximum(1 - zi ** 2, 0.0)) * np.cos(2 * i * np.pi * phi)
    yi = np.sqrt(np.maximum(1 - zi ** 2, 0.0)) * np.sin(2 * i * np.pi * phi)
    return jnp.asarray(r * np.stack([xi, yi, zi], axis=-1), dtype=jnp.float32)


def batch_viewpoint_params_to_matrix(batch_towards, batch_angle):
    axis_x = batch_towards
    zeros = jnp.zeros(axis_x.shape[0], dtype=axis_x.dtype)
    ones = jnp.ones(axis_x.shape[0], dtype=axis_x.dtype)
    axis_y = jnp.stack([-axis_x[:, 1], axis_x[:, 0], zeros], axis=-1)
    mask_y = jnp.linalg.norm(axis_y, axis=-1) == 0
    axis_y = jnp.where(mask_y[:, None],
                       jnp.array([0.0, 1.0, 0.0], dtype=axis_x.dtype), axis_y)
    axis_x = axis_x / jnp.linalg.norm(axis_x, axis=-1, keepdims=True)
    axis_y = axis_y / jnp.linalg.norm(axis_y, axis=-1, keepdims=True)
    axis_z = jnp.cross(axis_x, axis_y)
    sin, cos = jnp.sin(batch_angle), jnp.cos(batch_angle)
    r1 = jnp.stack([ones, zeros, zeros, zeros, cos, -sin, zeros, sin, cos],
                   axis=-1).reshape(-1, 3, 3)
    r2 = jnp.stack([axis_x, axis_y, axis_z], axis=-1)
    return jnp.matmul(r2, r1)


def graspnet_stage1(end_points, params):
    # TODO(synk): reduced Pointnet2Backbone — FPS replaced by stride subsampling,
    #             radius ball-query by kNN, SA3/SA4 and both FP stages omitted.
    pointcloud = end_points["point_clouds"]
    b, n, _ = pointcloud.shape
    xyz = pointcloud[..., :3]
    end_points["input_xyz"] = xyz

    wp = params["kernel"]
    k = params["nsample"]
    num_view = params["num_view"]

    # ---- SA1 ----
    s1 = params["sa1_npoint"]
    idx1 = jnp.arange(s1) * (n // s1)
    xyz1 = xyz[:, idx1, :]
    g1_xyz, _ = knn_group(xyz, xyz1, k)
    f1 = sa1_pointnet(_pack_coords(g1_xyz), wp,
                      tile_m=params["tile_m_sa1"], nsample=k)        # [B*S1, 128]

    # ---- SA2 + ApproachNet MLP, fused (neighbor features gathered in-kernel) ----
    s2 = params["sa2_npoint"]
    idx2 = jnp.arange(s2) * (s1 // s2)
    xyz2 = xyz1[:, idx2, :]
    g2_xyz, nbr_idx = knn_group(xyz1, xyz2, k)
    flat_idx = (nbr_idx
                + jnp.arange(b, dtype=nbr_idx.dtype)[:, None, None] * s1
                ).reshape(-1).astype(jnp.int32)                      # [B*S2*K]
    f2, vscore_pad = sa2_approach(flat_idx, _pack_coords(g2_xyz), f1, wp,
                                  tile_m=params["tile_m_sa2"], nsample=k)

    seed_xyz = xyz2                                                  # [B, num_seed, 3]
    seed_features = jnp.transpose(f2.reshape(b, s2, -1),
                                  (0, 2, 1)).astype(jnp.float32)     # NCW
    end_points["fp2_xyz"] = seed_xyz
    end_points["fp2_features"] = seed_features

    view_score = vscore_pad[:, :num_view].reshape(b, s2, num_view)
    end_points["view_score"] = view_score

    # ---- ApproachNet tail: top view selection + viewpoint rotation matrices ----
    top_view_scores = jnp.max(view_score, axis=2)
    top_view_inds = jnp.argmax(view_score, axis=2)
    template_views = generate_grasp_views(num_view)                  # [num_view, 3]
    vp_xyz = template_views[top_view_inds]                           # [B, num_seed, 3]
    batch_angle = jnp.zeros(b * s2, dtype=vp_xyz.dtype)
    vp_rot = batch_viewpoint_params_to_matrix(
        -vp_xyz.reshape(-1, 3), batch_angle).reshape(b, s2, 3, 3)

    end_points["grasp_top_view_inds"] = top_view_inds
    end_points["grasp_top_view_score"] = top_view_scores
    end_points["grasp_top_view_xyz"] = vp_xyz
    end_points["grasp_top_view_rot"] = vp_rot
    return end_points


# -----------------------------------------------------------------------------
# Deterministic parameter init (BN folded), kernel-form packing, tile selection
# -----------------------------------------------------------------------------
def _init_folded_mlp(key, dims, last_has_bn_relu):
    # TODO(synk): folding a real checkpoint must use running_mean / running_var.
    ws, bs = [], []
    n_layers = len(dims) - 1
    for i in range(n_layers):
        cin, cout = dims[i], dims[i + 1]
        key, kw, kg, kb = jax.random.split(key, 4)
        w = jax.random.normal(kw, (cin, cout), jnp.float32) / np.sqrt(cin)
        if last_has_bn_relu or i < n_layers - 1:
            gamma = 1.0 + 0.1 * jax.random.normal(kg, (cout,), jnp.float32)
            beta = 0.1 * jax.random.normal(kb, (cout,), jnp.float32)
            w = w * gamma[None, :]      # fold BN scale (running stats = identity)
            bias = beta                 # fold BN shift
        else:
            bias = 0.1 * jax.random.normal(kb, (cout,), jnp.float32)
        ws.append(w)
        bs.append(bias.reshape(1, cout))
    return ws, bs, key


def _pad2d(w, rows, cols):
    return jnp.pad(w, ((0, rows - w.shape[0]), (0, cols - w.shape[1])))


def pack_kernel_params(raw, num_view):
    """Split / zero-pad / bf16-cast the folded weights into kernel form."""
    bf = jnp.bfloat16
    sa1_w, sa1_b = raw["sa1_w"], raw["sa1_b"]
    sa2_w, sa2_b = raw["sa2_w"], raw["sa2_b"]
    vp_w, vp_b = raw["vp_w"], raw["vp_b"]
    vpad = max(_LANE, int(np.ceil(num_view / _LANE)) * _LANE)
    c1p = _LANE   # SA1 64-wide hidden channels zero-padded to one full lane
    return {
        # SA1: layer 1 stays f32 (VPU path), layers 2/3 bf16 for the MXU.
        # All hidden widths padded 64 -> 128 with exact zeros (lane-dense vregs).
        "sa1_w1": _pad2d(sa1_w[0], 3, c1p),
        "sa1_b1": _pad2d(sa1_b[0], 1, c1p),
        "sa1_w2": _pad2d(sa1_w[1], c1p, c1p).astype(bf),
        "sa1_b2": _pad2d(sa1_b[1], 1, c1p),
        "sa1_w3": _pad2d(sa1_w[2], c1p, sa1_w[2].shape[1]).astype(bf),
        "sa1_b3": sa1_b[2],
        # SA2 layer 1: rows 0..2 = relative xyz (VPU), rows 3..130 = features
        # (128-wide MXU contraction).  Same channel order as the [xyz, feats]
        # concatenation of the reference SA module.
        "sa2_w1x": sa2_w[0][:3],
        "sa2_w1f": sa2_w[0][3:].astype(bf),
        "sa2_b1": sa2_b[0],
        "sa2_w2": sa2_w[1].astype(bf), "sa2_b2": sa2_b[1],
        "sa2_w3": sa2_w[2].astype(bf), "sa2_b3": sa2_b[2],
        # ApproachNet: zero-pad the view dim to a multiple of 128 (exactly
        # equivalent after slicing the first num_view output columns).
        "vp_w1": _pad2d(vp_w[0], vp_w[0].shape[0], vpad).astype(bf),
        "vp_b1": _pad2d(vp_b[0], 1, vpad),
        "vp_w2": _pad2d(vp_w[1], vpad, vpad).astype(bf),
        "vp_b2": _pad2d(vp_b[1], 1, vpad),
        "vp_w3": _pad2d(vp_w[2], vpad, vpad).astype(bf),
        "vp_b3": _pad2d(vp_b[2], 1, vpad),
    }


def _choose_tile(m, bytes_per_row, budget_bytes, cap=512):
    """Largest sublane-aligned divisor of m that fits the per-tile VMEM budget,
    preferring >=2 grid steps and an even step count (v7x dual-TensorCore)."""
    cands = [t for t in range(1, min(cap, m) + 1)
             if m % t == 0 and (t % 8 == 0 or t == m)]
    if not cands:
        return m
    fit = [t for t in cands if t * bytes_per_row <= budget_bytes] or [min(cands)]
    even = [t for t in fit if m // t >= 2 and (m // t) % 2 == 0]
    multi = [t for t in fit if m // t >= 2]
    pool = even or multi or fit
    return max(pool)


def build_params(key, *, input_feature_dim=0, num_view=64, num_seed=16,
                 sa1_npoint=32, nsample=8, batch=2):
    # TODO(synk): extra input features not supported by the SA1 VPU layer-1 path.
    assert input_feature_dim == 0
    raw = {}
    sa1_dims = [3 + input_feature_dim, 64, 64, 128]
    raw["sa1_w"], raw["sa1_b"], key = _init_folded_mlp(key, sa1_dims, True)
    sa2_dims = [128 + 3, 128, 128, 256]
    raw["sa2_w"], raw["sa2_b"], key = _init_folded_mlp(key, sa2_dims, True)
    vp_dims = [256, num_view, num_view, num_view]
    raw["vp_w"], raw["vp_b"], key = _init_folded_mlp(key, vp_dims, False)

    # Per-row live-VMEM estimates (f32 intermediates) for the tile chooser.
    # Budget is conservative enough for v5e's 16 MiB scoped default and v7x's
    # 64 MiB physical VMEM; the SA2 kernel itself only keeps [tile_m, 256]-sized
    # buffers live thanks to the per-neighbor running-max structure.
    budget = 12 * 1024 * 1024
    sa1_row = nsample * 128 * 4 * 3
    sa2_row = 256 * 4 * 2 + 128 * 4 * 4
    params = {
        "num_view": num_view,
        "sa1_npoint": sa1_npoint,
        "sa2_npoint": num_seed,
        "nsample": nsample,
        "kernel": pack_kernel_params(raw, num_view),
        "tile_m_sa1": _choose_tile(batch * sa1_npoint, sa1_row, budget, cap=256),
        "tile_m_sa2": _choose_tile(batch * num_seed, sa2_row, budget, cap=256),
    }
    return params, key


# -----------------------------------------------------------------------------
if __name__ == "__main__":
    key = jax.random.PRNGKey(0)
    B, N = 2, 64                 # small point cloud
    NUM_SEED, NUM_VIEW = 16, 64  # scaled-down (original: 1024 seeds, 300 views)

    params, key = build_params(key, input_feature_dim=0, num_view=NUM_VIEW,
                               num_seed=NUM_SEED, sa1_npoint=32, nsample=8,
                               batch=B)

    key, kpc = jax.random.split(key)
    point_clouds = jax.random.uniform(kpc, (B, N, 3), jnp.float32,
                                      minval=-0.5, maxval=0.5)
    end_points = {"point_clouds": point_clouds}

    end_points = graspnet_stage1(end_points, params)

    jax.block_until_ready(end_points["view_score"])
    jax.block_until_ready(end_points["grasp_top_view_rot"])

    assert end_points["fp2_features"].shape == (B, 256, NUM_SEED)
    assert end_points["fp2_xyz"].shape == (B, NUM_SEED, 3)
    assert end_points["view_score"].shape == (B, NUM_SEED, NUM_VIEW)
    assert end_points["grasp_top_view_rot"].shape == (B, NUM_SEED, 3, 3)
    assert bool(jnp.all(jnp.isfinite(end_points["view_score"])))
    assert bool(jnp.all(jnp.isfinite(end_points["fp2_features"])))

    print("KERNEL_OK")
</pallas_src>

<mosaic_0001>
module attributes {stable_mosaic.version = 11 : i64} {
  func.func @_sa1_kernel(%arg0: i32, %arg1: memref<32x128xf32, #tpu.memory_space<vmem>>, %arg2: memref<3x128xf32, #tpu.memory_space<vmem>>, %arg3: memref<1x128xf32, #tpu.memory_space<vmem>>, %arg4: memref<128x128xbf16, #tpu.memory_space<vmem>>, %arg5: memref<1x128xf32, #tpu.memory_space<vmem>>, %arg6: memref<128x128xbf16, #tpu.memory_space<vmem>>, %arg7: memref<1x128xf32, #tpu.memory_space<vmem>>, %arg8: memref<32x128xf32, #tpu.memory_space<vmem>>) attributes {dimension_semantics = [#tpu.dimension_semantics<parallel>], iteration_bounds = array<i64: 2>, scalar_prefetch = 0 : i64, scratch_operands = 0 : i64, tpu.core_type = #tpu.core_type<tc>, window_params = [{transform_indices = @transform_0, window_bounds = array<i64: 32, 128>}, {pipeline_mode = #tpu.pipeline_mode<synchronous>, transform_indices = @transform_1, window_bounds = array<i64: 3, 128>}, {pipeline_mode = #tpu.pipeline_mode<synchronous>, transform_indices = @transform_2, window_bounds = array<i64: 1, 128>}, {pipeline_mode = #tpu.pipeline_mode<synchronous>, transform_indices = @transform_3, window_bounds = array<i64: 128, 128>}, {pipeline_mode = #tpu.pipeline_mode<synchronous>, transform_indices = @transform_4, window_bounds = array<i64: 1, 128>}, {pipeline_mode = #tpu.pipeline_mode<synchronous>, transform_indices = @transform_5, window_bounds = array<i64: 128, 128>}, {pipeline_mode = #tpu.pipeline_mode<synchronous>, transform_indices = @transform_6, window_bounds = array<i64: 1, 128>}, {transform_indices = @transform_7, window_bounds = array<i64: 32, 128>}]} {
    %c0 = arith.constant 0 : index
    %c0_0 = arith.constant 0 : index
    %0 = vector.load %arg1[%c0, %c0_0] : memref<32x128xf32, #tpu.memory_space<vmem>>, vector<32x128xf32>
    %c0_1 = arith.constant 0 : index
    %c0_2 = arith.constant 0 : index
    %1 = vector.load %arg2[%c0_1, %c0_2] : memref<3x128xf32, #tpu.memory_space<vmem>>, vector<3x128xf32>
    %c0_3 = arith.constant 0 : index
    %c0_4 = arith.constant 0 : index
    %2 = vector.load %arg3[%c0_3, %c0_4] : memref<1x128xf32, #tpu.memory_space<vmem>>, vector<1x128xf32>
    %3 = vector.extract_strided_slice %0 {offsets = [0, 0], sizes = [32, 8], strides = [1, 1]} : vector<32x128xf32> to vector<32x8xf32>
    %4 = vector.shape_cast %3 : vector<32x8xf32> to vector<32x8x1xf32>
    %5 = vector.extract_strided_slice %1 {offsets = [0, 0], sizes = [1, 128], strides = [1, 1]} : vector<3x128xf32> to vector<1x128xf32>
    %6 = vector.shape_cast %5 : vector<1x128xf32> to vector<128xf32>
    %7 = vector.shape_cast %6 : vector<128xf32> to vector<1x1x128xf32>
    %8 = vector.broadcast %4 : vector<32x8x1xf32> to vector<32x8x128xf32>
    %9 = vector.broadcast %7 : vector<1x1x128xf32> to vector<32x8x128xf32>
    %10 = arith.mulf %8, %9 : vector<32x8x128xf32>
    %11 = vector.extract_strided_slice %0 {offsets = [0, 8], sizes = [32, 8], strides = [1, 1]} : vector<32x128xf32> to vector<32x8xf32>
    %12 = vector.shape_cast %11 : vector<32x8xf32> to vector<32x8x1xf32>
    %13 = vector.extract_strided_slice %1 {offsets = [1, 0], sizes = [1, 128], strides = [1, 1]} : vector<3x128xf32> to vector<1x128xf32>
    %14 = vector.shape_cast %13 : vector<1x128xf32> to vector<128xf32>
    %15 = vector.shape_cast %14 : vector<128xf32> to vector<1x1x128xf32>
    %16 = vector.broadcast %12 : vector<32x8x1xf32> to vector<32x8x128xf32>
    %17 = vector.broadcast %15 : vector<1x1x128xf32> to vector<32x8x128xf32>
    %18 = arith.mulf %16, %17 : vector<32x8x128xf32>
    %19 = arith.addf %10, %18 : vector<32x8x128xf32>
    %20 = vector.extract_strided_slice %0 {offsets = [0, 16], sizes = [32, 8], strides = [1, 1]} : vector<32x128xf32> to vector<32x8xf32>
    %21 = vector.shape_cast %20 : vector<32x8xf32> to vector<32x8x1xf32>
    %22 = vector.extract_strided_slice %1 {offsets = [2, 0], sizes = [1, 128], strides = [1, 1]} : vector<3x128xf32> to vector<1x128xf32>
    %23 = vector.shape_cast %22 : vector<1x128xf32> to vector<128xf32>
    %24 = vector.shape_cast %23 : vector<128xf32> to vector<1x1x128xf32>
    %25 = vector.broadcast %21 : vector<32x8x1xf32> to vector<32x8x128xf32>
    %26 = vector.broadcast %24 : vector<1x1x128xf32> to vector<32x8x128xf32>
    %27 = arith.mulf %25, %26 : vector<32x8x128xf32>
    %28 = arith.addf %19, %27 : vector<32x8x128xf32>
    %29 = vector.shape_cast %2 : vector<1x128xf32> to vector<1x1x128xf32>
    %30 = vector.broadcast %29 : vector<1x1x128xf32> to vector<32x8x128xf32>
    %31 = arith.addf %28, %30 : vector<32x8x128xf32>
    %cst = arith.constant 0.000000e+00 : f32
    %32 = vector.broadcast %cst : f32 to vector<32x8x128xf32>
    %33 = arith.maximumf %31, %32 : vector<32x8x128xf32>
    %34 = vector.shape_cast %33 : vector<32x8x128xf32> to vector<256x128xf32>
    %35 = arith.truncf %34 : vector<256x128xf32> to vector<256x128xbf16>
    %c0_5 = arith.constant 0 : index
    %c0_6 = arith.constant 0 : index
    %36 = vector.load %arg4[%c0_5, %c0_6] : memref<128x128xbf16, #tpu.memory_space<vmem>>, vector<128x128xbf16>
    %cst_7 = arith.constant dense<0.000000e+00> : vector<256x128xf32>
    %37 = tpu.matmul %35, %36, %cst_7 {dimension_numbers = #tpu.dot_dimension_numbers<[1], [0], [0], [1], [0, 0, 1, 1], [], []>} : vector<256x128xbf16>, vector<128x128xbf16>, vector<256x128xf32> -> vector<256x128xf32>
    %c0_8 = arith.constant 0 : index
    %c0_9 = arith.constant 0 : index
    %38 = vector.load %arg5[%c0_8, %c0_9] : memref<1x128xf32, #tpu.memory_space<vmem>>, vector<1x128xf32>
    %39 = vector.broadcast %38 : vector<1x128xf32> to vector<256x128xf32>
    %40 = arith.addf %37, %39 : vector<256x128xf32>
    %cst_10 = arith.constant 0.000000e+00 : f32
    %41 = vector.broadcast %cst_10 : f32 to vector<256x128xf32>
    %42 = arith.maximumf %40, %41 : vector<256x128xf32>
    %43 = arith.truncf %42 : vector<256x128xf32> to vector<256x128xbf16>
    %c0_11 = arith.constant 0 : index
    %c0_12 = arith.constant 0 : index
    %44 = vector.load %arg6[%c0_11, %c0_12] : memref<128x128xbf16, #tpu.memory_space<vmem>>, vector<128x128xbf16>
    %cst_13 = arith.constant dense<0.000000e+00> : vector<256x128xf32>
    %45 = tpu.matmul %43, %44, %cst_13 {dimension_numbers = #tpu.dot_dimension_numbers<[1], [0], [0], [1], [0, 0, 1, 1], [], []>} : vector<256x128xbf16>, vector<128x128xbf16>, vector<256x128xf32> -> vector<256x128xf32>
    %c0_14 = arith.constant 0 : index
    %c0_15 = arith.constant 0 : index
    %46 = vector.load %arg7[%c0_14, %c0_15] : memref<1x128xf32, #tpu.memory_space<vmem>>, vector<1x128xf32>
    %47 = vector.broadcast %46 : vector<1x128xf32> to vector<256x128xf32>
    %48 = arith.addf %45, %47 : vector<256x128xf32>
    %cst_16 = arith.constant 0.000000e+00 : f32
    %49 = vector.broadcast %cst_16 : f32 to vector<256x128xf32>
    %50 = arith.maximumf %48, %49 : vector<256x128xf32>
    %51 = vector.shape_cast %50 : vector<256x128xf32> to vector<32x8x128xf32>
    %cst_17 = arith.constant dense<0xFF800000> : vector<32x128xf32>
    %52 = vector.multi_reduction <maximumf>, %51, %cst_17 [1] : vector<32x8x128xf32> to vector<32x128xf32>
    %c0_18 = arith.constant 0 : index
    %c0_19 = arith.constant 0 : index
    %53 = vector.load %arg8[%c0_18, %c0_19] : memref<32x128xf32, #tpu.memory_space<vmem>>, vector<32x128xf32>
    tpu.vector_store %arg8[%c0_18, %c0_19], %52 {strides = array<i32>} : memref<32x128xf32, #tpu.memory_space<vmem>>, vector<32x128xf32>,
    return
  }
  func.func @transform_0(%arg0: i32) -> (i32, i32) {
    %c0_i32 = arith.constant 0 : i32
    %c0_i32_0 = arith.constant 0 : i32
    return %arg0, %c0_i32 : i32, i32
  }
  func.func @transform_1(%arg0: i32) -> (i32, i32) {
    %c0_i32 = arith.constant 0 : i32
    %c0_i32_0 = arith.constant 0 : i32
    %c0_i32_1 = arith.constant 0 : i32
    return %c0_i32, %c0_i32_0 : i32, i32
  }
  func.func @transform_2(%arg0: i32) -> (i32, i32) {
    %c0_i32 = arith.constant 0 : i32
    %c0_i32_0 = arith.constant 0 : i32
    %c0_i32_1 = arith.constant 0 : i32
    return %c0_i32, %c0_i32_0 : i32, i32
  }
  func.func @transform_3(%arg0: i32) -> (i32, i32) {
    %c0_i32 = arith.constant 0 : i32
    %c0_i32_0 = arith.constant 0 : i32
    %c0_i32_1 = arith.constant 0 : i32
    return %c0_i32, %c0_i32_0 : i32, i32
  }
  func.func @transform_4(%arg0: i32) -> (i32, i32) {
    %c0_i32 = arith.constant 0 : i32
    %c0_i32_0 = arith.constant 0 : i32
    %c0_i32_1 = arith.constant 0 : i32
    return %c0_i32, %c0_i32_0 : i32, i32
  }
  func.func @transform_5(%arg0: i32) -> (i32, i32) {
    %c0_i32 = arith.constant 0 : i32
    %c0_i32_0 = arith.constant 0 : i32
    %c0_i32_1 = arith.constant 0 : i32
    return %c0_i32, %c0_i32_0 : i32, i32
  }
  func.func @transform_6(%arg0: i32) -> (i32, i32) {
    %c0_i32 = arith.constant 0 : i32
    %c0_i32_0 = arith.constant 0 : i32
    %c0_i32_1 = arith.constant 0 : i32
    return %c0_i32, %c0_i32_0 : i32, i32
  }
  func.func @transform_7(%arg0: i32) -> (i32, i32) {
    %c0_i32 = arith.constant 0 : i32
    %c0_i32_0 = arith.constant 0 : i32
    return %arg0, %c0_i32 : i32, i32
  }
}

</mosaic_0001>

<bundles_post_ra>
// kernel: tpu_custom_call.1
= control target key start
LH: loop header
LB: loop body
LE: loop exit
PB: predicated region body
PF: predicated region fallthrough
CT: control target
= control target key end

     0   :  { %12 = vsyncpa [#allocation3], 0  ;;  %s3109_s0 = inlined_call_operand.hbm [shape: f32[64,128], index: 0, kind: input, shape index: {}]   ;;  %s3110_s1 = inlined_call_operand.hbm [shape: f32[3,128], index: 1, kind: input, shape index: {}]   ;;  %s3111_s2 = inlined_call_operand.vmem [shape: f32[1,128], index: 2, kind: input, shape index: {}]   ;;  %s3112_s3 = inlined_call_operand.hbm [shape: bf16[128,128], index: 3, kind: input, shape index: {}]   ;;  %s3113_s4 = inlined_call_operand.vmem [shape: f32[1,128], index: 4, kind: input, shape index: {}]   ;;  %s3114_s5 = inlined_call_operand.hbm [shape: bf16[128,128], index: 5, kind: input, shape index: {}]   ;;  %s3115_s6 = inlined_call_operand.vmem [shape: f32[1,128], index: 6, kind: input, shape index: {}]   ;;  %s3116_s7 = inlined_call_operand.hbm [shape: f32[64,128], index: 7, kind: output, shape index: {}]  }
   0x1   :  { %14 = vsyncpa [#allocation3 + $0x1], 0 }
   0x2   :  { %15 = vsyncpa [#allocation6], 0 }
   0x3   :  { %16 = vsyncpa [#allocation9], 0 }
   0x4   :  { %17 = vsyncpa [#allocation4], 0 }
   0x5   :  { %19 = vsyncpa [#allocation4 + $0x1], 0  ;;  %s2538_s24 = smov 0   ;;  %s2540_s25 = smov 0  }
   0x6   :  { %s2542_s26 = smov 0   ;;  %s2544_s27 = smov 0  }
   0x7 LB: > { %s2559_s28 = sadd.s32 4294967295, %s2485_s27   ;;  %s2013_s29 = sadd.s32 4294967294, %s2485_s27   ;;  %s2485_s27 = sphi %s2544_s27, %s3139_s27   ;;  %s2481_s26 = sphi %s2542_s26, %s3138_s26   ;;  %s2477_s25 = sphi %s2540_s25, %s3137_s25   ;;  %s2473_s24 = sphi %s2538_s24, %s3136_s24  }
   0x8   : > { %p45_p0 = scmp.ne.s32.totalorder %s2477_s25, %s2473_s24  ;;  %p3117_p1 = scmp.eq.s32.totalorder %s2559_s28, 0 }
   0x9   : > { %p201_p3 = scmp.eq.s32.totalorder %s2013_s29, 1  ;;  %p2014_p5 = scmp.ge.s32.totalorder %s2485_s27, 1 }
   0xa   : > { %p2568_p4 = por %p3117_p1, %p45_p0  ;;  %p208_p7 = scmp.lt.s32.totalorder %s2485_s27, 3 }
   0xb   : > { %p2573_p6 = por %p201_p3, %p45_p0  ;;  %s2487_s10 = smov [#allocation5]  }
   0xc   : > { %s3120_s30 = scalar_select %p2568_p4, 1, 0 }
   0xd   : > { %s3121_s8 = scalar_select %p2573_p6, 1, 0 }
   0xe   : > { %p2578_p8 = pnand %p2014_p5, %p208_p7  ;;  %s221_s11 = sshll.u32 %s2487_s10, 4  ;;  %s222_s11 = int_to_ptr.vmem [resolvable:$true] %s221_s11 }
   0xf   : > { %s2488_s12 = smov [#allocation7]   ;;  %s2489_s15 = smov [#allocation8]  }
  0x10   : > { %s3122_s9 = scalar_select %p2578_p8, 1, 0 }
  0x11   : > { %p2214_p10 = pneg %p2578_p8  ;;  %s234_s13 = sshll.u32 %s2488_s12, 4  ;;  %s2591_s13 = int_to_ptr.vmem [resolvable:$true] %s234_s13 }
  0x12   : > { %s2593_s16 = sshll.u32 %s2489_s15, 4  ;;  %s2297_s19 = scalar_lea.hbm %s3110_s1, 64  ;;  %s251_s16 = int_to_ptr.vmem [resolvable:$true] %s2593_s16 }
  0x13   : > { %p2587_p11 = pnand %p2214_p10, %p3117_p1  ;;  %p2298_p12 = scmp.ne.s32.totalorder %s3110_s1, %s2297_s19 }
  0x14   : > { %p2304_p5 = scmp.lt.u32.totalorder %s2297_s19, %s3110_s1 }
  0x15   : > { %p2603_p13 = pneg %p2587_p11 }
  0x17   : > { %p2300_p0 = pnand %p2603_p13, %p2298_p12 }
  0x19   : > { %p2301_p3 = pneg %p2300_p0 }
  0x1b   : > { %p2306_p7 = pnand %p2304_p5, %p2301_p3 }
  0x1d   : > { %2309 = shalt.err (!%p2306_p7)
}
  0x1e   : > { %s2310_s10 = scalar_lea.vmem %s222_s11, 64  ;;  %p2318_p2 = scmp.lt.s32.totalorder %s222_s11, %s222_s11 }
  0x1f   : > { %p2311_p10 = scmp.ne.s32.totalorder %s222_s11, %s2310_s10  ;;  %p2319_p6 = scmp.lt.s32.totalorder %s2310_s10, %s2310_s10 }
  0x21   : > { %p2313_p9 = pnand %p2311_p10, %p2603_p13  ;;  %p2320_p4 = por %p2319_p6, %p2318_p2 }
  0x23   : > { %p2314_p1 = pneg %p2313_p9 }
  0x25   : > { %p2321_p8 = pnand %p2320_p4, %p2314_p1 }
  0x27   : > { %2324 = shalt.err (!%p2321_p8)
}
  0x28   : > { %2217 = dma.hbm_to_vmem [thread:$0]  (!%p2587_p11), %s3110_s1, 64, %s222_s11, [#allocation6]  }
  0x29   : > { %s2325_s19 = scalar_lea.hbm %s3112_s3, 1024 }
  0x2a   : > { %p2326_p9 = scmp.ne.s32.totalorder %s3112_s3, %s2325_s19  ;;  %p2332_p1 = scmp.lt.u32.totalorder %s2325_s19, %s3112_s3 }
  0x2c   : > { %p2328_p12 = pnand %p2326_p9, %p2603_p13 }
  0x2e   : > { %p2329_p2 = pneg %p2328_p12 }
  0x30   : > { %p2334_p4 = pnand %p2332_p1, %p2329_p2 }
  0x32   : > { %2337 = shalt.err (!%p2334_p4)
}
  0x33   : > { %s2338_s11 = scalar_lea.vmem %s2591_s13, 1024  ;;  %p2346_p3 = scmp.lt.s32.totalorder %s2591_s13, %s2591_s13 }
  0x34   : > { %p2339_p6 = scmp.ne.s32.totalorder %s2591_s13, %s2338_s11  ;;  %p2347_p5 = scmp.lt.s32.totalorder %s2338_s11, %s2338_s11 }
  0x36   : > { %p2341_p8 = pnand %p2339_p6, %p2603_p13  ;;  %p2348_p7 = por %p2347_p5, %p2346_p3 }
  0x38   : > { %p2342_p0 = pneg %p2341_p8 }
  0x3a   : > { %p2349_p10 = pnand %p2348_p7, %p2342_p0 }
  0x3c   : > { %2352 = shalt.err (!%p2349_p10)
}
  0x3d   : > { %s2490_s10 = smov 64   ;;  %s2491_s12 = smov 4  }
  0x3e   : > { %2220 = dma.hbm_to_vmem [thread:$0]  (!%p2587_p11), %s3112_s3, 1024, %s2591_s13, [#allocation6], %s2490_s10, %s2490_s10, %s2491_s12  }
  0x3f   : > { %s2353_s20 = scalar_lea.hbm %s3114_s5, 1024 }
  0x40   : > { %p2354_p9 = scmp.ne.s32.totalorder %s3114_s5, %s2353_s20  ;;  %p2360_p1 = scmp.lt.u32.totalorder %s2353_s20, %s3114_s5 }
  0x42   : > { %p2356_p12 = pnand %p2354_p9, %p2603_p13 }
  0x44   : > { %p2357_p2 = pneg %p2356_p12 }
  0x46   : > { %p2362_p4 = pnand %p2360_p1, %p2357_p2 }
  0x48   : > { %2365 = shalt.err (!%p2362_p4)
}
  0x49   : > { %s2366_s15 = scalar_lea.vmem %s251_s16, 1024  ;;  %p2374_p3 = scmp.lt.s32.totalorder %s251_s16, %s251_s16 }
  0x4a   : > { %p2367_p6 = scmp.ne.s32.totalorder %s251_s16, %s2366_s15  ;;  %p2375_p5 = scmp.lt.s32.totalorder %s2366_s15, %s2366_s15 }
  0x4c   : > { %p2369_p8 = pnand %p2367_p6, %p2603_p13  ;;  %p2376_p7 = por %p2375_p5, %p2374_p3 }
  0x4e   : > { %p2370_p0 = pneg %p2369_p8 }
  0x50   : > { %p2377_p10 = pnand %p2376_p7, %p2370_p0 }
  0x52   : > { %2380 = shalt.err (!%p2377_p10)
}
  0x53   : > { %2223 = dma.hbm_to_vmem [thread:$0]  (!%p2587_p11), %s3114_s5, 1024, %s251_s16, [#allocation9], %s2490_s10, %s2490_s10, %s2491_s12  }
  0x54   : > { %s2662_s22 = sadd.s32 1, %s2485_s27   ;;  %s32_s14 = sadd.s32 1, %s2481_s26 }
  0x55   : > { %s29_s18 = ssub.s32 %s2485_s27, %s2662_s22  ;;  %p39_p9 = scmp.ne.s32.totalorder %s2481_s26, %s2477_s25 }
  0x56   : > { %p30_p13 = scmp.eq.s32.totalorder %s29_s18, 0  ;;  %p40_p12 = scmp.eq.s32.totalorder %s2485_s27, 0 }
  0x57   : > { %p2235_p2 = scmp.lt.s32.totalorder %s2485_s27, 2  ;;  %p3125_p4 = scmp.eq.s32.totalorder %s2559_s28, 1 }
  0x58   : > { %s2672_s19 = scalar_select %p30_p13, %s2481_s26, %s32_s14  }
  0x59   : > { %p41_p1 = por %p40_p12, %p39_p9  ;;  %p2676_p6 = por %p3125_p4, %p39_p9 }
  0x5a   : > { %s267_s21 = sand.u32 1, %s2481_s26   ;;  %s2052_s23 = sshll.u32 %s2485_s27, 9 }
  0x5b   : > { %s2019_s16 = sshll.u32 %s267_s21, 5  ;;  %s2685_s29 = scalar_lea.hbm %s3109_s0, %s2052_s23 }
  0x5c   : > { %s271_s11 = scalar_lea.vmem [#allocation2], %s2019_s16  ;;  %p2687_p11 = pnand %p2235_p2, %p41_p1 }
  0x5d   : > { %s278_s15 = sshll.u32 %s271_s11, 4  ;;  %s2693_s17 = scalar_lea.sflag [#allocation3], %s267_s21  ;;  %s2691_s15 = int_to_ptr.vmem [resolvable:$true] %s278_s15 }
  0x5e   : > { %s2381_s18 = scalar_lea.hbm %s2685_s29, 512  ;;  %p2383_p0 = pneg %p2687_p11 }
  0x5f   : > { %p2382_p8 = scmp.ne.s32.totalorder %s2685_s29, %s2381_s18  ;;  %s2386_s16 = scalar_lea.hbm %s3109_s0, 1024 }
  0x60   : > { %p2387_p7 = scmp.lt.u32.totalorder %s2685_s29, %s3109_s0  ;;  %p2388_p10 = scmp.lt.u32.totalorder %s2386_s16, %s2381_s18 }
  0x61   : > { %p2384_p3 = pnand %p2383_p0, %p2382_p8  ;;  %p2390_p9 = scmp.lt.u32.totalorder %s2381_s18, %s2685_s29 }
  0x62   : > { %p2389_p13 = por %p2388_p10, %p2387_p7 }
  0x63   : > { %p2385_p5 = pneg %p2384_p3 }
  0x64   : > { %p2391_p12 = por %p2390_p9, %p2389_p13 }
  0x66   : > { %p2392_p2 = pnand %p2391_p12, %p2385_p5 }
  0x68   : > { %2395 = shalt.err (!%p2392_p2)
}
  0x69   : > { %s2396_s21 = scalar_lea.vmem %s2691_s15, 512  ;;  %s2492_s11 = smov [#allocation2]  }
  0x6a   : > { %p2397_p1 = scmp.ne.s32.totalorder %s2691_s15, %s2396_s21  ;;  %s2401_s14 = sshll.u32 %s2492_s11, 4  ;;  %s2402_s14 = int_to_ptr.vmem [resolvable:$false] %s2401_s14 }
  0x6b   : > { %s2403_s23 = scalar_lea.vmem %s2402_s14, 1024  ;;  %p2404_p3 = scmp.lt.s32.totalorder %s2691_s15, %s2402_s14 }
  0x6c   : > { %p2399_p4 = pnand %p2397_p1, %p2383_p0  ;;  %p2405_p7 = scmp.lt.s32.totalorder %s2403_s23, %s2396_s21 }
  0x6e   : > { %p2400_p8 = pneg %p2399_p4  ;;  %p2406_p10 = por %p2405_p7, %p2404_p3 }
  0x70   : > { %p2407_p13 = pnand %p2406_p10, %p2400_p8 }
  0x72   : > { %2410 = shalt.err (!%p2407_p13)
}
  0x73   : > { %s2493_s18 = smov 128   ;;  %s2494_s16 = smov 8  }
  0x74   : > { %2227 = dma.hbm_to_vmem [thread:$0]  (!%p2687_p11), %s2685_s29, 512, %s2691_s15, %s2693_s17, %s2493_s18, %s2493_s18, %s2494_s16  }
  0x75   : > { %p3128_p0 = scmp.ne.s32.totalorder %s3122_s9, 0 }
  0x76   : > { %s2724_s10 = sand.u32 (!%p3128_p0), 1, %s2477_s25   ;;  %p3129_p5 = scmp.ne.s32.totalorder (!%p3128_p0), %s3120_s30, 0 }
  0x77   : > { %290 = sbr.rel (%p3128_p0) target bundleno = 926 (0x39e), region = 48  ;;  %s2023_s12 = sshll.u32 (!%p3128_p0), %s2724_s10, 5 }
  0x78   : > { %s293_s21 = scalar_lea.sflag (!%p3128_p0), [#allocation3], %s2724_s10  ;;  %s2730_s11 = scalar_lea.vmem (!%p3128_p0), [#allocation2], %s2023_s12 }
  0x7e   : > { %2456 = dma.done.wait (%p3129_p5), %s293_s21, 512  }
  0x7f   : > { %2458 = vsyncadd (%p3129_p5), %s293_s21, 4294966784  ;;  %p3130_p11 = scmp.eq.s32.totalorder %s2559_s28, 0 }
  0x81   : > { %2460 = dma.done.wait (%p3130_p11), [#allocation6], 1088   ;;  %p3131_p9 = pmov %p3130_p11 }
  0x83   : > { %2462 = vsyncadd (%p3131_p9), [#allocation6], 4294966208  ;;  %p3132_p12 = pmov %p3131_p9 }
  0x84   : > { %p3133_p2 = pmov %p3131_p9 }
  0x85   : > { %2464 = dma.done.wait (%p3132_p12), [#allocation9], 1024  }
  0x86   : > { %2466 = vsyncadd (%p3133_p2), [#allocation9], 4294966272  ;;  %v348_v0 = vlaneseq  ;;  %v342_v4 = vld [vmem:[%s2730_s11] sm:$0xff]  ;;  %v2282_v10 = vld [vmem:[#allocation7 + $0x8] sm:$0xff]   ;;  %vm1854_vm0 = vcmask 1041409   ;;  %vm1856_vm1 = vcmask 1042434  }
  0x87   : > { %v2281_v7 = vld [vmem:[#allocation7] sm:$0xff]   ;;  %v2283_v11 = vld [vmem:[#allocation7 + $0x10] sm:$0xff]   ;;  %v2284_v14 = vld [vmem:[#allocation7 + $0x18] sm:$0xff]   ;;  %vm1858_vm2 = vcmask 1043459   ;;  %vm1860_vm3 = vcmask 1044484   ;;  %vm1862_vm4 = vcmask 1045509  }
  0x88   : > { %v349_v1 = vshrl.u32 %v348_v0, 7  ;;  %2102 = vmatprep.subr.bf16.mxu0 %v2281_v7  ;;  %v2285_v15 = vld [vmem:[#allocation7 + $0x20] sm:$0xff]   ;;  %v2286_v16 = vld [vmem:[#allocation7 + $0x28] sm:$0xff]   ;;  %v2287_v19 = vld [vmem:[#allocation7 + $0x30] sm:$0xff]   ;;  %vm1864_vm5 = vcmask 1046534   ;;  %vm1866_vm6 = vcmask 1047559  }
  0x89   : > { %2103 = vmatpush3.bf16.msra.mxu0 %v2281_v7  ;;  %v2288_v22 = vld [vmem:[#allocation7 + $0x38] sm:$0xff]   ;;  %v343_v27 = vld [vmem:[%s2730_s11 + $0x8] sm:$0xff]  ;;  %v344_v36 = vld [vmem:[%s2730_s11 + $0x10] sm:$0xff]  ;;  %s3007_s14 = scalar_lea.vmem [#allocation10], %s2023_s12  ;;  %s2053_s23 = sshll.u32 %s2559_s28, 9 }
  0x8a   : > { %v2744_v2 = vsub.s32 0, %v349_v1  ;;  %v2746_v3 = vsub.s32 1, %v349_v1  ;;  %v2750_v6 = vsub.s32 3, %v349_v1  ;;  %v2753_v9 = vsub.s32 2, %v349_v1  ;;  %2104 = vmatprep.subr.bf16.mxu0 %v2282_v10  ;;  %v346_v47 = vld [vmem:[#allocation5] sm:$0x7]  ;;  %s3060_s21 = scalar_lea.hbm %s3116_s7, %s2053_s23 }
  0x8b   : > { %v2757_v17 = vsub.s32 5, %v349_v1  ;;  %v2759_v18 = vsub.s32 4, %v349_v1  ;;  %v2763_v23 = vsub.s32 7, %v349_v1  ;;  %v2765_v24 = vsub.s32 6, %v349_v1  ;;  %s1911_s18 = sshll.u32 %s3007_s14, 4  ;;  %s1898_s28 = scalar_lea.sflag [#allocation4], %s2724_s10  ;;  %s3062_s18 = int_to_ptr.vmem [resolvable:$true] %s1911_s18 }
  0x8c   : > { %v351_v5 = vrot.slane %v342_v4, %v2744_v2  ;;  %v358_v8 = vrot.slane %v342_v4, %v2746_v3  ;;  %v372_v12 = vrot.slane %v342_v4, %v2750_v6  ;;  %v365_v13 = vrot.slane %v342_v4, %v2753_v9  ;;  %s2495_s30 = smov [#allocation10]  }
  0x8d   : > { %2105 = vmatpush3.bf16.msra.mxu0 %v2282_v10  ;;  %v386_v20 = vrot.slane %v342_v4, %v2757_v17  ;;  %v379_v21 = vrot.slane %v342_v4, %v2759_v18  ;;  %v400_v25 = vrot.slane %v342_v4, %v2763_v23  ;;  %v393_v26 = vrot.slane %v342_v4, %v2765_v24  ;;  %s2415_s9 = sshll.u32 %s2495_s30, 4  ;;  %s2416_s9 = int_to_ptr.vmem [resolvable:$false] %s2415_s9 }
  0x8e   : > { %610 = vbcast.lane.b32.xlu1 %v351_v5, 264  ;;  %353 = vbcast.lane.b32.xlu0 %v351_v5, 256  ;;  %v414_v28 = vrot.slane %v343_v27, %v2746_v3  ;;  %v407_v29 = vrot.slane %v343_v27, %v2744_v2  ;;  %v428_v30 = vrot.slane %v343_v27, %v2750_v6  ;;  %s2417_s29 = scalar_lea.vmem %s2416_s9, 1024  ;;  %p2418_p3 = scmp.lt.s32.totalorder %s3062_s18, %s2416_s9 }
  0x8f   : > { %2106 = vmatprep.subr.bf16.mxu0 %v2283_v11  ;;  %v421_v31 = vrot.slane %v343_v27, %v2753_v9  ;;  %v442_v32 = vrot.slane %v343_v27, %v2757_v17  ;;  %v435_v33 = vrot.slane %v343_v27, %v2759_v18  ;;  %v456_v34 = vrot.slane %v343_v27, %v2763_v23 }
  0x90   : > { %v449_v35 = vrot.slane %v343_v27, %v2765_v24  ;;  %v470_v37 = vrot.slane %v344_v36, %v2746_v3  ;;  %v463_v38 = vrot.slane %v344_v36, %v2744_v2  ;;  %v484_v39 = vrot.slane %v344_v36, %v2750_v6 }
  0x91   : > { %2107 = vmatpush3.bf16.msra.mxu0 %v2283_v11  ;;  %v477_v40 = vrot.slane %v344_v36, %v2753_v9  ;;  %v498_v43 = vrot.slane %v344_v36, %v2757_v17  ;;  %v491_v44 = vrot.slane %v344_v36, %v2759_v18  ;;  %v2786_v50 = vrot.slane %v346_v47, %v2744_v2  ;;  %v2809_v11 = vld [vmem:[%s3111_s2] ss:$0 sm:$0xff] }
  0x92   : > { %614 = vbcast.lane.b32.xlu1 %v358_v8, 264  ;;  %360 = vbcast.lane.b32.xlu0 %v358_v8, 256  ;;  %v2789_v51 = vrot.slane %v346_v47, %v2746_v3  ;;  %v512_v52 = vrot.slane %v344_v36, %v2763_v23  ;;  %v505_v53 = vrot.slane %v344_v36, %v2765_v24 }
  0x93   : > { %2108 = vmatprep.subr.bf16.mxu0 %v2284_v14  ;;  %v2794_v54 = vrot.slane %v346_v47, %v2753_v9 }
  0x95   : > { %2109 = vmatpush3.bf16.msra.mxu0 %v2284_v14 }
  0x96   : > { %374 = vbcast.lane.b32.xlu1 %v372_v12, 256  ;;  %367 = vbcast.lane.b32.xlu0 %v365_v13, 256 }
  0x97   : > { %2110 = vmatprep.subr.bf16.mxu0 %v2285_v15 }
  0x99   : > { %2111 = vmatpush3.bf16.msra.mxu0 %v2285_v15 }
  0x9a   : > { %622 = vbcast.lane.b32.xlu1 %v372_v12, 264  ;;  %618 = vbcast.lane.b32.xlu0 %v365_v13, 264 }
  0x9b   : > { %2112 = vmatprep.subr.bf16.mxu0 %v2286_v16 }
  0x9d   : > { %2113 = vmatpush3.bf16.msra.mxu0 %v2286_v16 }
  0x9e   : > { %810 = vbcast.lane.b32.xlu1 %v358_v8, 272  ;;  %806 = vbcast.lane.b32.xlu0 %v351_v5, 272 }
  0x9f   : > { %2114 = vmatprep.subr.bf16.mxu0 %v2287_v19 }
  0xa1   : > { %2115 = vmatpush3.bf16.msra.mxu0 %v2287_v19 }
  0xa2   : > { %818 = vbcast.lane.b32.xlu1 %v372_v12, 272  ;;  %814 = vbcast.lane.b32.xlu0 %v365_v13, 272 }
  0xa3   : > { %2116 = vmatprep.subr.bf16.mxu0 %v2288_v22 }
  0xa5   : > { %2117 = vmatpush3.bf16.msra.mxu0 %v2288_v22 }
  0xa6   : > { %388 = vbcast.lane.b32.xlu1 %v386_v20, 256  ;;  %381 = vbcast.lane.b32.xlu0 %v379_v21, 256 }
  0xaa   : > { %630 = vbcast.lane.b32.xlu1 %v386_v20, 264  ;;  %626 = vbcast.lane.b32.xlu0 %v379_v21, 264 }
  0xae   : > { %402 = vbcast.lane.b32.xlu1 %v400_v25, 256  ;;  %395 = vbcast.lane.b32.xlu0 %v393_v26, 256 }
  0xb2   : > { %638 = vbcast.lane.b32.xlu1 %v400_v25, 264  ;;  %634 = vbcast.lane.b32.xlu0 %v393_v26, 264 }
  0xb6   : > { %826 = vbcast.lane.b32.xlu1 %v386_v20, 272  ;;  %822 = vbcast.lane.b32.xlu0 %v379_v21, 272 }
  0xba   : > { %834 = vbcast.lane.b32.xlu1 %v400_v25, 272  ;;  %830 = vbcast.lane.b32.xlu0 %v393_v26, 272 }
  0xbe   : > { %416 = vbcast.lane.b32.xlu1 %v414_v28, 256  ;;  %409 = vbcast.lane.b32.xlu0 %v407_v29, 256 }
  0xc2   : > { %646 = vbcast.lane.b32.xlu1 %v414_v28, 264  ;;  %642 = vbcast.lane.b32.xlu0 %v407_v29, 264 }
  0xc6   : > { %430 = vbcast.lane.b32.xlu1 %v428_v30, 256  ;;  %423 = vbcast.lane.b32.xlu0 %v421_v31, 256 }
  0xca   : > { %654 = vbcast.lane.b32.xlu1 %v428_v30, 264  ;;  %650 = vbcast.lane.b32.xlu0 %v421_v31, 264 }
  0xce   : > { %842 = vbcast.lane.b32.xlu1 %v414_v28, 272  ;;  %838 = vbcast.lane.b32.xlu0 %v407_v29, 272 }
  0xd2   : > { %850 = vbcast.lane.b32.xlu1 %v428_v30, 272  ;;  %846 = vbcast.lane.b32.xlu0 %v421_v31, 272  ;;  %v2816_v30 = vld [vmem:[%s2730_s11 + $0x18] sm:$0xff]  ;;  %s2411_s11 = scalar_lea.vmem %s3062_s18, 512 }
  0xd3   : > { %v526_v36 = vrot.slane %v2816_v30, %v2746_v3  ;;  %v533_v3 = vrot.slane %v2816_v30, %v2753_v9  ;;  %p2412_p1 = scmp.ne.s32.totalorder %s3062_s18, %s2411_s11  ;;  %p2419_p7 = scmp.lt.s32.totalorder %s2417_s29, %s2411_s11 }
  0xd5   : > { %p2413_p4 = pnand %p2412_p1, %p2676_p6  ;;  %p2420_p10 = por %p2419_p7, %p2418_p3 }
  0xd6   : > { %444 = vbcast.lane.b32.xlu1 %v442_v32, 256  ;;  %437 = vbcast.lane.b32.xlu0 %v435_v33, 256 }
  0xd7   : > { %p2414_p8 = pneg %p2413_p4 }
  0xd9   : > { %p2421_p13 = pnand %p2420_p10, %p2414_p8 }
  0xda   : > { %662 = vbcast.lane.b32.xlu1 %v442_v32, 264  ;;  %658 = vbcast.lane.b32.xlu0 %v435_v33, 264 }
  0xde   : > { %458 = vbcast.lane.b32.xlu1 %v456_v34, 256  ;;  %451 = vbcast.lane.b32.xlu0 %v449_v35, 256 }
  0xe2   : > { %670 = vbcast.lane.b32.xlu1 %v456_v34, 264  ;;  %666 = vbcast.lane.b32.xlu0 %v449_v35, 264 }
  0xe6   : > { %858 = vbcast.lane.b32.xlu1 %v442_v32, 272  ;;  %854 = vbcast.lane.b32.xlu0 %v435_v33, 272 }
  0xea   : > { %866 = vbcast.lane.b32.xlu1 %v456_v34, 272  ;;  %862 = vbcast.lane.b32.xlu0 %v449_v35, 272 }
  0xee   : > { %472 = vbcast.lane.b32.xlu1 %v470_v37, 256  ;;  %465 = vbcast.lane.b32.xlu0 %v463_v38, 256 }
  0xf2   : > { %678 = vbcast.lane.b32.xlu1 %v470_v37, 264  ;;  %674 = vbcast.lane.b32.xlu0 %v463_v38, 264 }
  0xf6   : > { %486 = vbcast.lane.b32.xlu1 %v484_v39, 256  ;;  %479 = vbcast.lane.b32.xlu0 %v477_v40, 256 }
  0xfa   : > { %686 = vbcast.lane.b32.xlu1 %v484_v39, 264  ;;  %682 = vbcast.lane.b32.xlu0 %v477_v40, 264 }
  0xfe   : > { %874 = vbcast.lane.b32.xlu1 %v470_v37, 272  ;;  %870 = vbcast.lane.b32.xlu0 %v463_v38, 272  ;;  %v519_v37 = vrot.slane %v2816_v30, %v2744_v2 }
 0x100   : > { %v611_v41 = vpop.permute.xlu1 %610  ;;  %v354_v42 = vpop.permute.xlu0 %353 }
 0x101   : > { %v740_v57 = vmul.f32 %v2789_v51, %v611_v41  ;;  %v576_v58 = vmul.f32 %v2786_v50, %v354_v42 }
 0x102   : > { %882 = vbcast.lane.b32.xlu1 %v484_v39, 272  ;;  %878 = vbcast.lane.b32.xlu0 %v477_v40, 272 }
 0x103   : > { %v772_v1 = vadd.f32 %v740_v57, %v576_v58 }
 0x104   : > { %v615_v45 = vpop.permute.xlu1 %614  ;;  %v361_v46 = vpop.permute.xlu0 %360 }
 0x105   : > { %v741_v59 = vmul.f32 %v2789_v51, %v615_v45  ;;  %v577_v60 = vmul.f32 %v2786_v50, %v361_v46  ;;  %v540_v45 = vrot.slane %v2816_v30, %v2750_v6 }
 0x106   : > { %500 = vbcast.lane.b32.xlu1 %v498_v43, 256  ;;  %493 = vbcast.lane.b32.xlu0 %v491_v44, 256 }
 0x107   : > { %v773_v4 = vadd.f32 %v741_v59, %v577_v60 }
 0x108   : > { %v375_v48 = vpop.permute.xlu1 %374  ;;  %v368_v49 = vpop.permute.xlu0 %367 }
 0x109   : > { %v579_v8 = vmul.f32 %v2786_v50, %v375_v48  ;;  %v578_v10 = vmul.f32 %v2786_v50, %v368_v49 }
 0x10a   : > { %694 = vbcast.lane.b32.xlu1 %v498_v43, 264  ;;  %690 = vbcast.lane.b32.xlu0 %v491_v44, 264 }
 0x10c   : > { %v623_v55 = vpop.permute.xlu1 %622  ;;  %v619_v56 = vpop.permute.xlu0 %618 }
 0x10d   : > { %v743_v61 = vmul.f32 %v2789_v51, %v623_v55  ;;  %v742_v62 = vmul.f32 %v2789_v51, %v619_v56 }
 0x10e   : > { %514 = vbcast.lane.b32.xlu1 %v512_v52, 256  ;;  %507 = vbcast.lane.b32.xlu0 %v505_v53, 256 }
 0x10f   : > { %v775_v14 = vadd.f32 %v743_v61, %v579_v8  ;;  %v774_v15 = vadd.f32 %v742_v62, %v578_v10 }
 0x110   : > { %v811_v63 = vpop.permute.xlu1 %810  ;;  %v807_v0 = vpop.permute.xlu0 %806 }
 0x111   : > { %v937_v5 = vmul.f32 %v2794_v54, %v811_v63  ;;  %v936_v7 = vmul.f32 %v2794_v54, %v807_v0 }
 0x112   : > { %702 = vbcast.lane.b32.xlu1 %v512_v52, 264  ;;  %698 = vbcast.lane.b32.xlu0 %v505_v53, 264 }
 0x113   : > { %v969_v12 = vadd.f32 %v937_v5, %v773_v4  ;;  %v968_v13 = vadd.f32 %v936_v7, %v772_v1 }
 0x114   : > { %v819_v16 = vpop.permute.xlu1 %818  ;;  %v815_v19 = vpop.permute.xlu0 %814 }
 0x115   : > { %v939_v20 = vmul.f32 %v2794_v54, %v819_v16  ;;  %v938_v21 = vmul.f32 %v2794_v54, %v815_v19  ;;  %v1006_v22 = vadd.f32 %v2809_v11, %v968_v13  ;;  %v1007_v25 = vadd.f32 %v2809_v11, %v969_v12 }
 0x116   : > { %890 = vbcast.lane.b32.xlu1 %v498_v43, 272  ;;  %886 = vbcast.lane.b32.xlu0 %v491_v44, 272 }
 0x117   : > { %v971_v26 = vadd.f32 %v939_v20, %v775_v14  ;;  %v970_v27 = vadd.f32 %v938_v21, %v774_v15  ;;  %v1038_v28 = vmax.f32 %v1006_v22, 0.0  ;;  %v1039_v29 = vmax.f32 %v1007_v25, 0.0 }
 0x118   : > { %v389_v31 = vpop.permute.xlu1 %388  ;;  %v382_v32 = vpop.permute.xlu0 %381 }
 0x119   : > { %v1009_v33 = vadd.f32 %v2809_v11, %v971_v26  ;;  %v1008_v34 = vadd.f32 %v2809_v11, %v970_v27  ;;  %v1070_v35 = vpack.c.bf16 %v1039_v29, %v1038_v28  ;;  %v581_v49 = vmul.f32 %v2786_v50, %v389_v31 }
 0x11a   : > { %898 = vbcast.lane.b32.xlu1 %v512_v52, 272  ;;  %894 = vbcast.lane.b32.xlu0 %v505_v53, 272  ;;  %v580_v52 = vmul.f32 %v2786_v50, %v382_v32  ;;  %v554_v26 = vrot.slane %v2816_v30, %v2757_v17  ;;  %v547_v27 = vrot.slane %v2816_v30, %v2759_v18 }
 0x11b   : > { %v1041_v38 = vmax.f32 %v1009_v33, 0.0  ;;  %v1040_v39 = vmax.f32 %v1008_v34, 0.0  ;;  %2118 = vmatprep.mubr.bf16.mxu0 %v1070_v35  ;;  %v561_v17 = vrot.slane %v2816_v30, %v2765_v24 }
 0x11c   : > { %v631_v40 = vpop.permute.xlu1 %630  ;;  %v627_v41 = vpop.permute.xlu0 %626 }
 0x11d   : > { %v1071_v42 = vpack.c.bf16 %v1041_v38, %v1040_v39  ;;  %v745_v47 = vmul.f32 %v2789_v51, %v631_v40  ;;  %v744_v48 = vmul.f32 %v2789_v51, %v627_v41 }
 0x11e   : > { %528 = vbcast.lane.b32.xlu1 %v526_v36, 256  ;;  %521 = vbcast.lane.b32.xlu0 %v519_v37, 256 }
 0x11f   : > { %2119 = vmatmul.mubr.bf16.vlgmr.msra.gmra.mrb[0].mxu0 %v1071_v42  ;;  %v777_v57 = vadd.f32 %v745_v47, %v581_v49  ;;  %v776_v9 = vadd.f32 %v744_v48, %v580_v52 }
 0x120   : > { %v403_v43 = vpop.permute.xlu1 %402  ;;  %v396_v44 = vpop.permute.xlu0 %395 }
 0x121   : > { %v583_v60 = vmul.f32 %v2786_v50, %v403_v43  ;;  %v582_v61 = vmul.f32 %v2786_v50, %v396_v44 }
 0x122   : > { %710 = vbcast.lane.b32.xlu1 %v526_v36, 264  ;;  %706 = vbcast.lane.b32.xlu0 %v519_v37, 264 }
 0x124   : > { %v639_v2 = vpop.permute.xlu1 %638  ;;  %v635_v46 = vpop.permute.xlu0 %634 }
 0x125   : > { %v747_v53 = vmul.f32 %v2789_v51, %v639_v2  ;;  %v746_v55 = vmul.f32 %v2789_v51, %v635_v46 }
 0x126   : > { %542 = vbcast.lane.b32.xlu1 %v540_v45, 256  ;;  %535 = vbcast.lane.b32.xlu0 %v533_v3, 256 }
 0x127   : > { %v779_v0 = vadd.f32 %v747_v53, %v583_v60  ;;  %v778_v1 = vadd.f32 %v746_v55, %v582_v61 }
 0x128   : > { %v827_v6 = vpop.permute.xlu1 %826  ;;  %v823_v56 = vpop.permute.xlu0 %822 }
 0x129   : > { %v941_v58 = vmul.f32 %v2794_v54, %v827_v6  ;;  %v940_v59 = vmul.f32 %v2794_v54, %v823_v56 }
 0x12a   : > { %718 = vbcast.lane.b32.xlu1 %v540_v45, 264  ;;  %714 = vbcast.lane.b32.xlu0 %v533_v3, 264 }
 0x12b   : > { %v973_v62 = vadd.f32 %v941_v58, %v777_v57  ;;  %v972_v63 = vadd.f32 %v940_v59, %v776_v9 }
 0x12c   : > { %v835_v4 = vpop.permute.xlu1 %834  ;;  %v831_v5 = vpop.permute.xlu0 %830 }
 0x12d   : > { %v1011_v7 = vadd.f32 %v2809_v11, %v973_v62  ;;  %v1010_v8 = vadd.f32 %v2809_v11, %v972_v63  ;;  %v943_v10 = vmul.f32 %v2794_v54, %v835_v4  ;;  %v942_v12 = vmul.f32 %v2794_v54, %v831_v5  ;;  %v2289_v62 = vld [vmem:[#allocation8] sm:$0xff]  }
 0x12e   : > { %906 = vbcast.lane.b32.xlu1 %v526_v36, 272  ;;  %902 = vbcast.lane.b32.xlu0 %v519_v37, 272  ;;  %v568_v36 = vrot.slane %v2816_v30, %v2763_v23 }
 0x12f   : > { %v1043_v13 = vmax.f32 %v1011_v7, 0.0  ;;  %v1042_v14 = vmax.f32 %v1010_v8, 0.0  ;;  %v975_v15 = vadd.f32 %v943_v10, %v779_v0  ;;  %v974_v16 = vadd.f32 %v942_v12, %v778_v1  ;;  %v2290_v1 = vld [vmem:[#allocation8 + $0x8] sm:$0xff]   ;;  %2150 = vmatprep.subr.bf16.mxu1 %v2289_v62 }
 0x130   : > { %v417_v19 = vpop.permute.xlu1 %416  ;;  %v410_v20 = vpop.permute.xlu0 %409  ;;  %2151 = vmatpush3.bf16.msra.mxu1 %v2289_v62 }
 0x131   : > { %v1013_v21 = vadd.f32 %v2809_v11, %v975_v15  ;;  %v1012_v22 = vadd.f32 %v2809_v11, %v974_v16  ;;  %v1072_v25 = vpack.c.bf16 %v1043_v13, %v1042_v14  ;;  %v585_v40 = vmul.f32 %v2786_v50, %v417_v19  ;;  %2152 = vmatprep.subr.bf16.mxu1 %v2290_v1  ;;  %v2291_v14 = vld [vmem:[#allocation8 + $0x10] sm:$0xff]  }
 0x132   : > { %914 = vbcast.lane.b32.xlu1 %v540_v45, 272  ;;  %910 = vbcast.lane.b32.xlu0 %v533_v3, 272  ;;  %v584_v41 = vmul.f32 %v2786_v50, %v410_v20  ;;  %v2292_v20 = vld [vmem:[#allocation8 + $0x18] sm:$0xff]  }
 0x133   : > { %v1045_v28 = vmax.f32 %v1013_v21, 0.0  ;;  %v1044_v29 = vmax.f32 %v1012_v22, 0.0  ;;  %2122 = vmatprep.mubr.bf16.mxu0 %v1072_v25  ;;  %v2293_v25 = vld [vmem:[#allocation8 + $0x20] sm:$0xff]  }
 0x134   : > { %v647_v31 = vpop.permute.xlu1 %646  ;;  %v643_v32 = vpop.permute.xlu0 %642  ;;  %2153 = vmatpush3.bf16.msra.mxu1 %v2290_v1 }
 0x135   : > { %v1073_v33 = vpack.c.bf16 %v1045_v28, %v1044_v29  ;;  %v749_v38 = vmul.f32 %v2789_v51, %v647_v31  ;;  %v748_v39 = vmul.f32 %v2789_v51, %v643_v32  ;;  %2154 = vmatprep.subr.bf16.mxu1 %v2291_v14 }
 0x136   : > { %556 = vbcast.lane.b32.xlu1 %v554_v26, 256  ;;  %549 = vbcast.lane.b32.xlu0 %v547_v27, 256 }
 0x137   : > { %2123 = vmatmul.mubr.bf16.gmra.mrb[4].mxu0 %v1073_v33  ;;  %v781_v45 = vadd.f32 %v749_v38, %v585_v40  ;;  %v780_v24 = vadd.f32 %v748_v39, %v584_v41 }
 0x138   : > { %v431_v34 = vpop.permute.xlu1 %430  ;;  %v424_v35 = vpop.permute.xlu0 %423  ;;  %2155 = vmatpush3.bf16.msra.mxu1 %v2291_v14 }
 0x139   : > { %v587_v2 = vmul.f32 %v2786_v50, %v431_v34  ;;  %v586_v46 = vmul.f32 %v2786_v50, %v424_v35  ;;  %2156 = vmatprep.subr.bf16.mxu1 %v2292_v20  ;;  %v2294_v35 = vld [vmem:[#allocation8 + $0x28] sm:$0xff]  }
 0x13a   : > { %726 = vbcast.lane.b32.xlu1 %v554_v26, 264  ;;  %722 = vbcast.lane.b32.xlu0 %v547_v27, 264 }
 0x13c   : > { %v655_v18 = vpop.permute.xlu1 %654  ;;  %v651_v37 = vpop.permute.xlu0 %650  ;;  %2157 = vmatpush3.bf16.msra.mxu1 %v2292_v20 }
 0x13d   : > { %v751_v42 = vmul.f32 %v2789_v51, %v655_v18  ;;  %v750_v43 = vmul.f32 %v2789_v51, %v651_v37  ;;  %2158 = vmatprep.subr.bf16.mxu1 %v2293_v25 }
 0x13e   : > { %570 = vbcast.lane.b32.xlu1 %v568_v36, 256  ;;  %563 = vbcast.lane.b32.xlu0 %v561_v17, 256 }
 0x13f   : > { %v783_v49 = vadd.f32 %v751_v42, %v587_v2  ;;  %v782_v52 = vadd.f32 %v750_v43, %v586_v46 }
 0x140   : > { %v843_v23 = vpop.permute.xlu1 %842  ;;  %v839_v44 = vpop.permute.xlu0 %838  ;;  %2159 = vmatpush3.bf16.msra.mxu1 %v2293_v25 }
 0x141   : > { %v945_v30 = vmul.f32 %v2794_v54, %v843_v23  ;;  %v944_v3 = vmul.f32 %v2794_v54, %v839_v44  ;;  %2160 = vmatprep.subr.bf16.mxu1 %v2294_v35 }
 0x142   : > { %734 = vbcast.lane.b32.xlu1 %v568_v36, 264  ;;  %730 = vbcast.lane.b32.xlu0 %v561_v17, 264 }
 0x143   : > { %v977_v47 = vadd.f32 %v945_v30, %v781_v45  ;;  %v976_v48 = vadd.f32 %v944_v3, %v780_v24 }
 0x144   : > { %v851_v53 = vpop.permute.xlu1 %850  ;;  %v847_v55 = vpop.permute.xlu0 %846  ;;  %2161 = vmatpush3.bf16.msra.mxu1 %v2294_v35 }
 0x145   : > { %v1015_v6 = vadd.f32 %v2809_v11, %v977_v47  ;;  %v1014_v56 = vadd.f32 %v2809_v11, %v976_v48  ;;  %v947_v57 = vmul.f32 %v2794_v54, %v851_v53  ;;  %v946_v9 = vmul.f32 %v2794_v54, %v847_v55 }
 0x146   : > { %922 = vbcast.lane.b32.xlu1 %v554_v26, 272  ;;  %918 = vbcast.lane.b32.xlu0 %v547_v27, 272 }
 0x147   : > { %v1047_v58 = vmax.f32 %v1015_v6, 0.0  ;;  %v1046_v59 = vmax.f32 %v1014_v56, 0.0  ;;  %v979_v60 = vadd.f32 %v947_v57, %v783_v49  ;;  %v978_v61 = vadd.f32 %v946_v9, %v782_v52 }
 0x148   : > { %v445_v63 = vpop.permute.xlu1 %444  ;;  %v438_v0 = vpop.permute.xlu0 %437 }
 0x149   : > { %v1017_v4 = vadd.f32 %v2809_v11, %v979_v60  ;;  %v1016_v5 = vadd.f32 %v2809_v11, %v978_v61  ;;  %v1074_v7 = vpack.c.bf16 %v1047_v58, %v1046_v59  ;;  %v589_v28 = vmul.f32 %v2786_v50, %v445_v63 }
 0x14a   : > { %930 = vbcast.lane.b32.xlu1 %v568_v36, 272  ;;  %926 = vbcast.lane.b32.xlu0 %v561_v17, 272  ;;  %v588_v29 = vmul.f32 %v2786_v50, %v438_v0 }
 0x14b   : > { %v1049_v8 = vmax.f32 %v1017_v4, 0.0  ;;  %v1048_v10 = vmax.f32 %v1016_v5, 0.0  ;;  %2126 = vmatprep.mubr.bf16.mxu0 %v1074_v7 }
 0x14c   : > { %v663_v12 = vpop.permute.xlu1 %662  ;;  %v659_v13 = vpop.permute.xlu0 %658 }
 0x14d   : > { %v1075_v15 = vpack.c.bf16 %v1049_v8, %v1048_v10  ;;  %v753_v26 = vmul.f32 %v2789_v51, %v663_v12  ;;  %v752_v27 = vmul.f32 %v2789_v51, %v659_v13 }
 0x14f   : > { %2127 = vmatmul.mubr.bf16.gmra.mrb[8].mxu0 %v1075_v15  ;;  %v785_v36 = vadd.f32 %v753_v26, %v589_v28  ;;  %v784_v17 = vadd.f32 %v752_v27, %v588_v29  ;;  %v2295_v29 = vld [vmem:[#allocation8 + $0x30] sm:$0xff]  }
 0x150   : > { %v459_v16 = vpop.permute.xlu1 %458  ;;  %v452_v19 = vpop.permute.xlu0 %451  ;;  %2162 = vmatprep.subr.bf16.mxu1 %v2295_v29 }
 0x151   : > { %v591_v38 = vmul.f32 %v2786_v50, %v459_v16  ;;  %v590_v39 = vmul.f32 %v2786_v50, %v452_v19  ;;  %2163 = vmatpush3.bf16.msra.mxu1 %v2295_v29 }
 0x154   : > { %v671_v21 = vpop.permute.xlu1 %670  ;;  %v667_v22 = vpop.permute.xlu0 %666 }
 0x155   : > { %v755_v31 = vmul.f32 %v2789_v51, %v671_v21  ;;  %v754_v32 = vmul.f32 %v2789_v51, %v667_v22 }
 0x157   : > { %v787_v42 = vadd.f32 %v755_v31, %v591_v38  ;;  %v786_v43 = vadd.f32 %v754_v32, %v590_v39  ;;  %v2296_v39 = vld [vmem:[#allocation8 + $0x38] sm:$0xff]  }
 0x158   : > { %v859_v33 = vpop.permute.xlu1 %858  ;;  %v855_v34 = vpop.permute.xlu0 %854  ;;  %2164 = vmatprep.subr.bf16.mxu1 %v2296_v39 }
 0x159   : > { %v949_v18 = vmul.f32 %v2794_v54, %v859_v33  ;;  %v948_v37 = vmul.f32 %v2794_v54, %v855_v34  ;;  %2165 = vmatpush3.bf16.msra.mxu1 %v2296_v39 }
 0x15b   : > { %v981_v40 = vadd.f32 %v949_v18, %v785_v36  ;;  %v980_v41 = vadd.f32 %v948_v37, %v784_v17 }
 0x15c   : > { %v867_v23 = vpop.permute.xlu1 %866  ;;  %v863_v44 = vpop.permute.xlu0 %862 }
 0x15d   : > { %v1019_v45 = vadd.f32 %v2809_v11, %v981_v40  ;;  %v1018_v24 = vadd.f32 %v2809_v11, %v980_v41  ;;  %v951_v30 = vmul.f32 %v2794_v54, %v867_v23  ;;  %v950_v3 = vmul.f32 %v2794_v54, %v863_v44 }
 0x15f   : > { %v1051_v2 = vmax.f32 %v1019_v45, 0.0  ;;  %v1050_v46 = vmax.f32 %v1018_v24, 0.0  ;;  %v983_v47 = vadd.f32 %v951_v30, %v787_v42  ;;  %v982_v48 = vadd.f32 %v950_v3, %v786_v43 }
 0x160   : > { %v473_v49 = vpop.permute.xlu1 %472  ;;  %v466_v52 = vpop.permute.xlu0 %465 }
 0x161   : > { %v1021_v53 = vadd.f32 %v2809_v11, %v983_v47  ;;  %v1020_v55 = vadd.f32 %v2809_v11, %v982_v48  ;;  %v1076_v6 = vpack.c.bf16 %v1051_v2, %v1050_v46  ;;  %v593_v4 = vmul.f32 %v2786_v50, %v473_v49 }
 0x162   : > { %v592_v5 = vmul.f32 %v2786_v50, %v466_v52 }
 0x163   : > { %v1053_v56 = vmax.f32 %v1021_v53, 0.0  ;;  %v1052_v57 = vmax.f32 %v1020_v55, 0.0  ;;  %2130 = vmatprep.mubr.bf16.mxu0 %v1076_v6 }
 0x164   : > { %v679_v9 = vpop.permute.xlu1 %678  ;;  %v675_v58 = vpop.permute.xlu0 %674 }
 0x165   : > { %v1077_v59 = vpack.c.bf16 %v1053_v56, %v1052_v57  ;;  %v757_v0 = vmul.f32 %v2789_v51, %v679_v9  ;;  %v756_v1 = vmul.f32 %v2789_v51, %v675_v58 }
 0x167   : > { %2131 = vmatmul.mubr.bf16.gmra.mrb[12].mxu0 %v1077_v59  ;;  %v789_v13 = vadd.f32 %v757_v0, %v593_v4  ;;  %v788_v14 = vadd.f32 %v756_v1, %v592_v5 }
 0x168   : > { %v487_v60 = vpop.permute.xlu1 %486  ;;  %v480_v61 = vpop.permute.xlu0 %479 }
 0x169   : > { %v595_v19 = vmul.f32 %v2786_v50, %v487_v60  ;;  %v594_v20 = vmul.f32 %v2786_v50, %v480_v61 }
 0x16c   : > { %v687_v62 = vpop.permute.xlu1 %686  ;;  %v683_v63 = vpop.permute.xlu0 %682 }
 0x16d   : > { %v759_v7 = vmul.f32 %v2789_v51, %v687_v62  ;;  %v758_v8 = vmul.f32 %v2789_v51, %v683_v63 }
 0x16f   : > { %v791_v25 = vadd.f32 %v759_v7, %v595_v19  ;;  %v790_v26 = vadd.f32 %v758_v8, %v594_v20 }
 0x170   : > { %v875_v10 = vpop.permute.xlu1 %874  ;;  %v871_v12 = vpop.permute.xlu0 %870 }
 0x171   : > { %v953_v15 = vmul.f32 %v2794_v54, %v875_v10  ;;  %v952_v16 = vmul.f32 %v2794_v54, %v871_v12 }
 0x173   : > { %v985_v21 = vadd.f32 %v953_v15, %v789_v13  ;;  %v984_v22 = vadd.f32 %v952_v16, %v788_v14 }
 0x174   : > { %v883_v27 = vpop.permute.xlu1 %882  ;;  %v879_v28 = vpop.permute.xlu0 %878 }
 0x175   : > { %v1023_v31 = vadd.f32 %v2809_v11, %v985_v21  ;;  %v1022_v32 = vadd.f32 %v2809_v11, %v984_v22  ;;  %v955_v33 = vmul.f32 %v2794_v54, %v883_v27  ;;  %v954_v34 = vmul.f32 %v2794_v54, %v879_v28 }
 0x177   : > { %v1055_v35 = vmax.f32 %v1023_v31, 0.0  ;;  %v1054_v36 = vmax.f32 %v1022_v32, 0.0  ;;  %v987_v17 = vadd.f32 %v955_v33, %v791_v25  ;;  %v986_v18 = vadd.f32 %v954_v34, %v790_v26 }
 0x178   : > { %v501_v37 = vpop.permute.xlu1 %500  ;;  %v494_v38 = vpop.permute.xlu0 %493 }
 0x179   : > { %v1025_v40 = vadd.f32 %v2809_v11, %v987_v17  ;;  %v1024_v41 = vadd.f32 %v2809_v11, %v986_v18  ;;  %v1078_v42 = vpack.c.bf16 %v1055_v35, %v1054_v36  ;;  %v597_v49 = vmul.f32 %v2786_v50, %v501_v37 }
 0x17a   : > { %v596_v52 = vmul.f32 %v2786_v50, %v494_v38 }
 0x17b   : > { %v1057_v43 = vmax.f32 %v1025_v40, 0.0  ;;  %v1056_v23 = vmax.f32 %v1024_v41, 0.0  ;;  %2134 = vmatprep.mubr.bf16.mxu0 %v1078_v42 }
 0x17c   : > { %v695_v44 = vpop.permute.xlu1 %694  ;;  %v691_v45 = vpop.permute.xlu0 %690 }
 0x17d   : > { %v1079_v24 = vpack.c.bf16 %v1057_v43, %v1056_v23  ;;  %v761_v47 = vmul.f32 %v2789_v51, %v695_v44  ;;  %v760_v48 = vmul.f32 %v2789_v51, %v691_v45 }
 0x17f   : > { %2135 = vmatmul.mubr.bf16.gmra.mrb[16].mxu0 %v1079_v24  ;;  %v793_v57 = vadd.f32 %v761_v47, %v597_v49  ;;  %v792_v9 = vadd.f32 %v760_v48, %v596_v52 }
 0x180   : > { %v515_v30 = vpop.permute.xlu1 %514  ;;  %v508_v3 = vpop.permute.xlu0 %507 }
 0x181   : > { %v599_v60 = vmul.f32 %v2786_v50, %v515_v30  ;;  %v598_v61 = vmul.f32 %v2786_v50, %v508_v3 }
 0x184   : > { %v703_v2 = vpop.permute.xlu1 %702  ;;  %v699_v46 = vpop.permute.xlu0 %698 }
 0x185   : > { %v763_v53 = vmul.f32 %v2789_v51, %v703_v2  ;;  %v762_v55 = vmul.f32 %v2789_v51, %v699_v46 }
 0x187   : > { %v795_v0 = vadd.f32 %v763_v53, %v599_v60  ;;  %v794_v1 = vadd.f32 %v762_v55, %v598_v61 }
 0x188   : > { %v891_v6 = vpop.permute.xlu1 %890  ;;  %v887_v56 = vpop.permute.xlu0 %886 }
 0x189   : > { %v957_v58 = vmul.f32 %v2794_v54, %v891_v6  ;;  %v956_v59 = vmul.f32 %v2794_v54, %v887_v56 }
 0x18b   : > { %v989_v62 = vadd.f32 %v957_v58, %v793_v57  ;;  %v988_v63 = vadd.f32 %v956_v59, %v792_v9 }
 0x18c   : > { %v899_v4 = vpop.permute.xlu1 %898  ;;  %v895_v5 = vpop.permute.xlu0 %894 }
 0x18d   : > { %v1027_v7 = vadd.f32 %v2809_v11, %v989_v62  ;;  %v1026_v8 = vadd.f32 %v2809_v11, %v988_v63  ;;  %v959_v10 = vmul.f32 %v2794_v54, %v899_v4  ;;  %v958_v12 = vmul.f32 %v2794_v54, %v895_v5 }
 0x18f   : > { %v1059_v13 = vmax.f32 %v1027_v7, 0.0  ;;  %v1058_v14 = vmax.f32 %v1026_v8, 0.0  ;;  %v991_v15 = vadd.f32 %v959_v10, %v795_v0  ;;  %v990_v16 = vadd.f32 %v958_v12, %v794_v1 }
 0x190   : > { %v529_v19 = vpop.permute.xlu1 %528  ;;  %v522_v20 = vpop.permute.xlu0 %521 }
 0x191   : > { %v1029_v21 = vadd.f32 %v2809_v11, %v991_v15  ;;  %v1028_v22 = vadd.f32 %v2809_v11, %v990_v16  ;;  %v1080_v25 = vpack.c.bf16 %v1059_v13, %v1058_v14  ;;  %v601_v18 = vmul.f32 %v2786_v50, %v529_v19 }
 0x192   : > { %v600_v37 = vmul.f32 %v2786_v50, %v522_v20 }
 0x193   : > { %v1061_v26 = vmax.f32 %v1029_v21, 0.0  ;;  %v1060_v27 = vmax.f32 %v1028_v22, 0.0  ;;  %2138 = vmatprep.mubr.bf16.mxu0 %v1080_v25 }
 0x194   : > { %v711_v28 = vpop.permute.xlu1 %710  ;;  %v707_v29 = vpop.permute.xlu0 %706 }
 0x195   : > { %v1081_v31 = vpack.c.bf16 %v1061_v26, %v1060_v27  ;;  %v765_v36 = vmul.f32 %v2789_v51, %v711_v28  ;;  %v764_v17 = vmul.f32 %v2789_v51, %v707_v29 }
 0x197   : > { %2139 = vmatmul.mubr.bf16.gmra.mrb[20].mxu0 %v1081_v31  ;;  %v797_v42 = vadd.f32 %v765_v36, %v601_v18  ;;  %v796_v43 = vadd.f32 %v764_v17, %v600_v37 }
 0x198   : > { %v543_v32 = vpop.permute.xlu1 %542  ;;  %v536_v33 = vpop.permute.xlu0 %535 }
 0x199   : > { %v603_v45 = vmul.f32 %v2786_v50, %v543_v32  ;;  %v602_v24 = vmul.f32 %v2786_v50, %v536_v33 }
 0x19c   : > { %v719_v34 = vpop.permute.xlu1 %718  ;;  %v715_v35 = vpop.permute.xlu0 %714 }
 0x19d   : > { %v767_v38 = vmul.f32 %v2789_v51, %v719_v34  ;;  %v766_v39 = vmul.f32 %v2789_v51, %v715_v35 }
 0x19f   : > { %v799_v2 = vadd.f32 %v767_v38, %v603_v45  ;;  %v798_v46 = vadd.f32 %v766_v39, %v602_v24 }
 0x1a0   : > { %v907_v40 = vpop.permute.xlu1 %906  ;;  %v903_v41 = vpop.permute.xlu0 %902 }
 0x1a1   : > { %v961_v23 = vmul.f32 %v2794_v54, %v907_v40  ;;  %v960_v44 = vmul.f32 %v2794_v54, %v903_v41 }
 0x1a3   : > { %v993_v30 = vadd.f32 %v961_v23, %v797_v42  ;;  %v992_v3 = vadd.f32 %v960_v44, %v796_v43 }
 0x1a4   : > { %v915_v47 = vpop.permute.xlu1 %914  ;;  %v911_v48 = vpop.permute.xlu0 %910 }
 0x1a5   : > { %v1031_v49 = vadd.f32 %v2809_v11, %v993_v30  ;;  %v1030_v52 = vadd.f32 %v2809_v11, %v992_v3  ;;  %v963_v53 = vmul.f32 %v2794_v54, %v915_v47  ;;  %v962_v55 = vmul.f32 %v2794_v54, %v911_v48  ;;  %v2951_v30 = vld [vmem:[%s3113_s4] ss:$0 sm:$0xff] }
 0x1a7   : > { %v1063_v6 = vmax.f32 %v1031_v49, 0.0  ;;  %v1062_v56 = vmax.f32 %v1030_v52, 0.0  ;;  %v995_v57 = vadd.f32 %v963_v53, %v799_v2  ;;  %v994_v9 = vadd.f32 %v962_v55, %v798_v46 }
 0x1a8   : > { %v557_v58 = vpop.permute.xlu1 %556  ;;  %v550_v59 = vpop.permute.xlu0 %549 }
 0x1a9   : > { %v1033_v60 = vadd.f32 %v2809_v11, %v995_v57  ;;  %v1032_v61 = vadd.f32 %v2809_v11, %v994_v9  ;;  %v1082_v62 = vpack.c.bf16 %v1063_v6, %v1062_v56  ;;  %v605_v15 = vmul.f32 %v2786_v50, %v557_v58 }
 0x1aa   : > { %v604_v16 = vmul.f32 %v2786_v50, %v550_v59 }
 0x1ab   : > { %v1065_v63 = vmax.f32 %v1033_v60, 0.0  ;;  %v1064_v0 = vmax.f32 %v1032_v61, 0.0  ;;  %2142 = vmatprep.mubr.bf16.mxu0 %v1082_v62 }
 0x1ac   : > { %v727_v1 = vpop.permute.xlu1 %726  ;;  %v723_v4 = vpop.permute.xlu0 %722 }
 0x1ad   : > { %v1083_v5 = vpack.c.bf16 %v1065_v63, %v1064_v0  ;;  %v769_v13 = vmul.f32 %v2789_v51, %v727_v1  ;;  %v768_v14 = vmul.f32 %v2789_v51, %v723_v4 }
 0x1af   : > { %2143 = vmatmul.mubr.bf16.gmra.mrb[24].mxu0 %v1083_v5  ;;  %v801_v25 = vadd.f32 %v769_v13, %v605_v15  ;;  %v800_v26 = vadd.f32 %v768_v14, %v604_v16 }
 0x1b0   : > { %v571_v7 = vpop.permute.xlu1 %570  ;;  %v564_v8 = vpop.permute.xlu0 %563 }
 0x1b1   : > { %v607_v29 = vmul.f32 %v2786_v50, %v571_v7  ;;  %v606_v31 = vmul.f32 %v2786_v50, %v564_v8 }
 0x1b4   : > { %v735_v10 = vpop.permute.xlu1 %734  ;;  %v731_v12 = vpop.permute.xlu0 %730 }
 0x1b5   : > { %v771_v19 = vmul.f32 %v2789_v51, %v735_v10  ;;  %v770_v20 = vmul.f32 %v2789_v51, %v731_v12 }
 0x1b7   : > { %v803_v34 = vadd.f32 %v771_v19, %v607_v29  ;;  %v802_v35 = vadd.f32 %v770_v20, %v606_v31 }
 0x1b8   : > { %v923_v21 = vpop.permute.xlu1 %922  ;;  %v919_v22 = vpop.permute.xlu0 %918 }
 0x1b9   : > { %v965_v27 = vmul.f32 %v2794_v54, %v923_v21  ;;  %v964_v28 = vmul.f32 %v2794_v54, %v919_v22 }
 0x1bb   : > { %v997_v32 = vadd.f32 %v965_v27, %v801_v25  ;;  %v996_v33 = vadd.f32 %v964_v28, %v800_v26 }
 0x1bc   : > { %v931_v36 = vpop.permute.xlu1 %930  ;;  %v927_v17 = vpop.permute.xlu0 %926 }
 0x1bd   : > { %v1035_v51 = vadd.f32 %v2809_v11, %v997_v32  ;;  %v1034_v18 = vadd.f32 %v2809_v11, %v996_v33  ;;  %v967_v37 = vmul.f32 %v2794_v54, %v931_v36  ;;  %v966_v38 = vmul.f32 %v2794_v54, %v927_v17 }
 0x1bf   : > { %v1067_v39 = vmax.f32 %v1035_v51, 0.0  ;;  %v1066_v40 = vmax.f32 %v1034_v18, 0.0  ;;  %v999_v41 = vadd.f32 %v967_v37, %v803_v34  ;;  %v998_v42 = vadd.f32 %v966_v38, %v802_v35 }
 0x1c1   : > { %v1037_v50 = vadd.f32 %v2809_v11, %v999_v41  ;;  %v1036_v43 = vadd.f32 %v2809_v11, %v998_v42  ;;  %v1084_v23 = vpack.c.bf16 %v1067_v39, %v1066_v40 }
 0x1c3   : > { %v1069_v44 = vmax.f32 %v1037_v50, 0.0  ;;  %v1068_v45 = vmax.f32 %v1036_v43, 0.0  ;;  %2146 = vmatprep.mubr.bf16.mxu0 %v1084_v23 }
 0x1c5   : > { %v1085_v24 = vpack.c.bf16 %v1069_v44, %v1068_v45 }
 0x1c7   : > { %2147 = vmatmul.mubr.bf16.gmra.mrb[28].mxu0 %v1085_v24 }
 0x1f2   : > { %v2120_v54 = vpop.f32.mrb[0].mxu0 }
 0x1f3   : > { %v1200_v3 = vadd.f32 %v2120_v54, %v2951_v30  ;;  %v1191_v2 = vpop.f32.mrb[1].mxu0 }
 0x1f4   : > { %v1192_v46 = vadd.f32 %v2951_v30, %v1191_v2  ;;  %v2121_v47 = vpop.f32.mrb[2].mxu0 }
 0x1f5   : > { %v1203_v11 = vadd.f32 %v2121_v47, %v2951_v30  ;;  %v1194_v48 = vpop.f32.mrb[3].mxu0  ;;  %v1320_v52 = vmax.f32 %v1200_v3, 0.0 }
 0x1f6   : > { %v1195_v49 = vadd.f32 %v2951_v30, %v1194_v48  ;;  %v1318_v55 = vmax.f32 %v1192_v46, 0.0 }
 0x1f7   : > { %v1321_v53 = vmax.f32 %v1203_v11, 0.0 }
 0x1f8   : > { %v1319_v6 = vmax.f32 %v1195_v49, 0.0 }
 0x1f9   : > { %v1351_v56 = vpack.c.bf16 %v1321_v53, %v1320_v52 }
 0x1fa   : > { %v1350_v57 = vpack.c.bf16 %v1319_v6, %v1318_v55 }
 0x1fc   : > { %2166 = vmatprep.mubr.bf16.mxu1 %v1350_v57 }
 0x1fd   : > { %2167 = vmatmul.mubr.bf16.vlgmr.msra.gmra.mrb[0].mxu1 %v1351_v56 }
 0x20a   : > { %v2124_v9 = vpop.f32.mrb[4].mxu0 }
 0x20b   : > { %v1216_v58 = vadd.f32 %v2124_v9, %v2951_v30  ;;  %v1207_v59 = vpop.f32.mrb[5].mxu0 }
 0x20c   : > { %v1208_v60 = vadd.f32 %v2951_v30, %v1207_v59  ;;  %v2125_v61 = vpop.f32.mrb[6].mxu0 }
 0x20d   : > { %v1219_v62 = vadd.f32 %v2125_v61, %v2951_v30  ;;  %v1210_v63 = vpop.f32.mrb[7].mxu0  ;;  %v1324_v1 = vmax.f32 %v1216_v58, 0.0 }
 0x20e   : > { %v1211_v0 = vadd.f32 %v2951_v30, %v1210_v63  ;;  %v1322_v5 = vmax.f32 %v1208_v60, 0.0 }
 0x20f   : > { %v1325_v4 = vmax.f32 %v1219_v62, 0.0 }
 0x210   : > { %v1323_v7 = vmax.f32 %v1211_v0, 0.0 }
 0x211   : > { %v1353_v8 = vpack.c.bf16 %v1325_v4, %v1324_v1 }
 0x212   : > { %v1352_v10 = vpack.c.bf16 %v1323_v7, %v1322_v5 }
 0x214   : > { %2170 = vmatprep.mubr.bf16.mxu1 %v1352_v10 }
 0x215   : > { %2171 = vmatmul.mubr.bf16.gmra.mrb[4].mxu1 %v1353_v8 }
 0x222   : > { %v2128_v12 = vpop.f32.mrb[8].mxu0 }
 0x223   : > { %v1232_v13 = vadd.f32 %v2128_v12, %v2951_v30  ;;  %v1223_v14 = vpop.f32.mrb[9].mxu0 }
 0x224   : > { %v1224_v15 = vadd.f32 %v2951_v30, %v1223_v14  ;;  %v2129_v16 = vpop.f32.mrb[10].mxu0 }
 0x225   : > { %v1235_v19 = vadd.f32 %v2129_v16, %v2951_v30  ;;  %v1226_v20 = vpop.f32.mrb[11].mxu0  ;;  %v1328_v22 = vmax.f32 %v1232_v13, 0.0 }
 0x226   : > { %v1227_v21 = vadd.f32 %v2951_v30, %v1226_v20  ;;  %v1326_v26 = vmax.f32 %v1224_v15, 0.0 }
 0x227   : > { %v1329_v25 = vmax.f32 %v1235_v19, 0.0 }
 0x228   : > { %v1327_v27 = vmax.f32 %v1227_v21, 0.0 }
 0x229   : > { %v1355_v28 = vpack.c.bf16 %v1329_v25, %v1328_v22 }
 0x22a   : > { %v1354_v29 = vpack.c.bf16 %v1327_v27, %v1326_v26 }
 0x22c   : > { %2174 = vmatprep.mubr.bf16.mxu1 %v1354_v29 }
 0x22d   : > { %2175 = vmatmul.mubr.bf16.gmra.mrb[8].mxu1 %v1355_v28 }
 0x23a   : > { %v2132_v31 = vpop.f32.mrb[12].mxu0 }
 0x23b   : > { %v1248_v32 = vadd.f32 %v2132_v31, %v2951_v30  ;;  %v1239_v33 = vpop.f32.mrb[13].mxu0 }
 0x23c   : > { %v1240_v34 = vadd.f32 %v2951_v30, %v1239_v33  ;;  %v2133_v35 = vpop.f32.mrb[14].mxu0 }
 0x23d   : > { %v1251_v36 = vadd.f32 %v2133_v35, %v2951_v30  ;;  %v1242_v17 = vpop.f32.mrb[15].mxu0  ;;  %v1332_v18 = vmax.f32 %v1248_v32, 0.0 }
 0x23e   : > { %v1243_v51 = vadd.f32 %v2951_v30, %v1242_v17  ;;  %v1330_v38 = vmax.f32 %v1240_v34, 0.0 }
 0x23f   : > { %v1333_v37 = vmax.f32 %v1251_v36, 0.0 }
 0x240   : > { %v1331_v39 = vmax.f32 %v1243_v51, 0.0  ;;  %v2988_v51 = vld [vmem:[%s3115_s6] ss:$0 sm:$0xff] }
 0x241   : > { %v1357_v40 = vpack.c.bf16 %v1333_v37, %v1332_v18 }
 0x242   : > { %v1356_v41 = vpack.c.bf16 %v1331_v39, %v1330_v38 }
 0x244   : > { %2178 = vmatprep.mubr.bf16.mxu1 %v1356_v41 }
 0x245   : > { %2179 = vmatmul.mubr.bf16.gmra.mrb[12].mxu1 %v1357_v40 }
 0x252   : > { %v2136_v42 = vpop.f32.mrb[16].mxu0 }
 0x253   : > { %v1264_v50 = vadd.f32 %v2136_v42, %v2951_v30  ;;  %v1255_v43 = vpop.f32.mrb[17].mxu0 }
 0x254   : > { %v1256_v23 = vadd.f32 %v2951_v30, %v1255_v43  ;;  %v2137_v44 = vpop.f32.mrb[18].mxu0 }
 0x255   : > { %v1267_v45 = vadd.f32 %v2137_v44, %v2951_v30  ;;  %v1258_v24 = vpop.f32.mrb[19].mxu0  ;;  %v1336_v3 = vmax.f32 %v1264_v50, 0.0 }
 0x256   : > { %v1259_v54 = vadd.f32 %v2951_v30, %v1258_v24  ;;  %v1334_v46 = vmax.f32 %v1256_v23, 0.0 }
 0x257   : > { %v1337_v2 = vmax.f32 %v1267_v45, 0.0 }
 0x258   : > { %v1335_v47 = vmax.f32 %v1259_v54, 0.0 }
 0x259   : > { %v1359_v11 = vpack.c.bf16 %v1337_v2, %v1336_v3 }
 0x25a   : > { %v1358_v48 = vpack.c.bf16 %v1335_v47, %v1334_v46 }
 0x25c   : > { %2182 = vmatprep.mubr.bf16.mxu1 %v1358_v48 }
 0x25d   : > { %2183 = vmatmul.mubr.bf16.gmra.mrb[16].mxu1 %v1359_v11 }
 0x26a   : > { %v2140_v49 = vpop.f32.mrb[20].mxu0 }
 0x26b   : > { %v1280_v52 = vadd.f32 %v2140_v49, %v2951_v30  ;;  %v1271_v53 = vpop.f32.mrb[21].mxu0 }
 0x26c   : > { %v1272_v55 = vadd.f32 %v2951_v30, %v1271_v53  ;;  %v2141_v6 = vpop.f32.mrb[22].mxu0 }
 0x26d   : > { %v1283_v56 = vadd.f32 %v2141_v6, %v2951_v30  ;;  %v1274_v57 = vpop.f32.mrb[23].mxu0  ;;  %v1340_v58 = vmax.f32 %v1280_v52, 0.0 }
 0x26e   : > { %v1275_v9 = vadd.f32 %v2951_v30, %v1274_v57  ;;  %v1338_v60 = vmax.f32 %v1272_v55, 0.0 }
 0x26f   : > { %v1341_v59 = vmax.f32 %v1283_v56, 0.0 }
 0x270   : > { %v1339_v61 = vmax.f32 %v1275_v9, 0.0 }
 0x271   : > { %v1361_v62 = vpack.c.bf16 %v1341_v59, %v1340_v58 }
 0x272   : > { %v1360_v63 = vpack.c.bf16 %v1339_v61, %v1338_v60 }
 0x274   : > { %2186 = vmatprep.mubr.bf16.mxu1 %v1360_v63 }
 0x275   : > { %2187 = vmatmul.mubr.bf16.gmra.mrb[20].mxu1 %v1361_v62 }
 0x282   : > { %v2144_v0 = vpop.f32.mrb[24].mxu0 }
 0x283   : > { %v1296_v1 = vadd.f32 %v2144_v0, %v2951_v30  ;;  %v1287_v4 = vpop.f32.mrb[25].mxu0 }
 0x284   : > { %v1288_v5 = vadd.f32 %v2951_v30, %v1287_v4  ;;  %v2145_v7 = vpop.f32.mrb[26].mxu0 }
 0x285   : > { %v1299_v8 = vadd.f32 %v2145_v7, %v2951_v30  ;;  %v1290_v10 = vpop.f32.mrb[27].mxu0  ;;  %v1344_v13 = vmax.f32 %v1296_v1, 0.0 }
 0x286   : > { %v1291_v12 = vadd.f32 %v2951_v30, %v1290_v10  ;;  %v1342_v15 = vmax.f32 %v1288_v5, 0.0 }
 0x287   : > { %v1345_v14 = vmax.f32 %v1299_v8, 0.0 }
 0x288   : > { %v1343_v16 = vmax.f32 %v1291_v12, 0.0 }
 0x289   : > { %v1363_v19 = vpack.c.bf16 %v1345_v14, %v1344_v13 }
 0x28a   : > { %v1362_v20 = vpack.c.bf16 %v1343_v16, %v1342_v15 }
 0x28c   : > { %2190 = vmatprep.mubr.bf16.mxu1 %v1362_v20 }
 0x28d   : > { %2191 = vmatmul.mubr.bf16.gmra.mrb[24].mxu1 %v1363_v19 }
 0x29a   : > { %v2148_v21 = vpop.f32.mrb[28].mxu0 }
 0x29b   : > { %v1312_v22 = vadd.f32 %v2148_v21, %v2951_v30  ;;  %v1303_v25 = vpop.f32.mrb[29].mxu0 }
 0x29c   : > { %v1304_v26 = vadd.f32 %v2951_v30, %v1303_v25  ;;  %v2149_v27 = vpop.f32.mrb[30].mxu0 }
 0x29d   : > { %v1315_v28 = vadd.f32 %v2149_v27, %v2951_v30  ;;  %v1306_v29 = vpop.f32.mrb[31].mxu0  ;;  %v1348_v32 = vmax.f32 %v1312_v22, 0.0 }
 0x29e   : > { %v1307_v31 = vadd.f32 %v2951_v30, %v1306_v29  ;;  %v1346_v34 = vmax.f32 %v1304_v26, 0.0 }
 0x29f   : > { %v1349_v33 = vmax.f32 %v1315_v28, 0.0 }
 0x2a0   : > { %v1347_v35 = vmax.f32 %v1307_v31, 0.0 }
 0x2a1   : > { %v1365_v36 = vpack.c.bf16 %v1349_v33, %v1348_v32 }
 0x2a2   : > { %v1364_v17 = vpack.c.bf16 %v1347_v35, %v1346_v34 }
 0x2a4   : > { %2194 = vmatprep.mubr.bf16.mxu1 %v1364_v17 }
 0x2a5   : > { %2195 = vmatmul.mubr.bf16.gmra.mrb[28].mxu1 %v1365_v36 }
 0x2d0   : > { %v2168_v18 = vpop.f32.mrb[0].mxu1 }
 0x2d1   : > { %v1480_v37 = vadd.f32 %v2168_v18, %v2988_v51  ;;  %v1471_v38 = vpop.f32.mrb[1].mxu1 }
 0x2d2   : > { %v1472_v39 = vadd.f32 %v2988_v51, %v1471_v38  ;;  %v2169_v30 = vpop.f32.mrb[2].mxu1 }
 0x2d3   : > { %v1600_v40 = vmax.f32 %v1480_v37, 0.0  ;;  %v1483_v41 = vadd.f32 %v2169_v30, %v2988_v51  ;;  %v1474_v42 = vpop.f32.mrb[3].mxu1 }
 0x2d4   : > { %v1598_v50 = vmax.f32 %v1472_v39, 0.0  ;;  %v1475_v43 = vadd.f32 %v2988_v51, %v1474_v42 }
 0x2d5   : > { %v1642_v23 = vrot.slane %v1600_v40, 4  ;;  %v1601_v44 = vmax.f32 %v1483_v41, 0.0 }
 0x2d6   : > { %v1630_v45 = vrot.slane %v1598_v50, 4  ;;  %v1599_v24 = vmax.f32 %v1475_v43, 0.0 }
 0x2d7   : > { %v1643_v54 = vmax.f32 %v1600_v40, %v1642_v23  ;;  %v1648_v3 = vrot.slane %v1601_v44, 4 }
 0x2d8   : > { %v1631_v2 = vmax.f32 %v1598_v50, %v1630_v45  ;;  %v1636_v46 = vrot.slane %v1599_v24, 4 }
 0x2d9   : > { %v1644_v47 = vrot.slane %v1643_v54, 2  ;;  %v1649_v11 = vmax.f32 %v1601_v44, %v1648_v3 }
 0x2da   : > { %v1632_v48 = vrot.slane %v1631_v2, 2  ;;  %v1637_v49 = vmax.f32 %v1599_v24, %v1636_v46 }
 0x2db   : > { %v1645_v52 = vmax.f32 %v1643_v54, %v1644_v47  ;;  %v1650_v53 = vrot.slane %v1649_v11, 2 }
 0x2dc   : > { %v1633_v55 = vmax.f32 %v1631_v2, %v1632_v48  ;;  %v1638_v6 = vrot.slane %v1637_v49, 2 }
 0x2dd   : > { %v1651_v56 = vmax.f32 %v1649_v11, %v1650_v53  ;;  %v1646_v58 = vrot.slane %v1645_v52, 1 }
 0x2de   : > { %v1634_v57 = vrot.slane %v1633_v55, 1  ;;  %v1639_v9 = vmax.f32 %v1637_v49, %v1638_v6 }
 0x2df   : > { %v1652_v59 = vrot.slane %v1651_v56, 1  ;;  %v1647_v63 = vmax.f32 %v1645_v52, %v1646_v58 }
 0x2e0   : > { %v1640_v60 = vrot.slane %v1639_v9, 1  ;;  %v1635_v61 = vmax.f32 %v1633_v55, %v1634_v57 }
 0x2e1   : > { %v1653_v0 = vmax.f32 %v1651_v56, %v1652_v59 }
 0x2e2   : > { %v1641_v62 = vmax.f32 %v1639_v9, %v1640_v60 }
 0x2e4   : > { %v1855_v1 = vsel %vm1854_vm0, %v1641_v62, %v1635_v61 }
 0x2e5   : > { %v1857_v4 = vsel %vm1856_vm1, %v1647_v63, %v1855_v1 }
 0x2e6   : > { %v1859_v5 = vsel %vm1858_vm2, %v1653_v0, %v1857_v4 }
 0x2e8   : > { %v2172_v7 = vpop.f32.mrb[4].mxu1 }
 0x2e9   : > { %v1496_v8 = vadd.f32 %v2172_v7, %v2988_v51  ;;  %v1487_v10 = vpop.f32.mrb[5].mxu1 }
 0x2ea   : > { %v1488_v12 = vadd.f32 %v2988_v51, %v1487_v10  ;;  %v2173_v13 = vpop.f32.mrb[6].mxu1 }
 0x2eb   : > { %v1604_v14 = vmax.f32 %v1496_v8, 0.0  ;;  %v1499_v15 = vadd.f32 %v2173_v13, %v2988_v51  ;;  %v1490_v16 = vpop.f32.mrb[7].mxu1 }
 0x2ec   : > { %v1602_v19 = vmax.f32 %v1488_v12, 0.0  ;;  %v1491_v20 = vadd.f32 %v2988_v51, %v1490_v16 }
 0x2ed   : > { %v1666_v21 = vrot.slane %v1604_v14, 4  ;;  %v1605_v22 = vmax.f32 %v1499_v15, 0.0 }
 0x2ee   : > { %v1654_v25 = vrot.slane %v1602_v19, 4  ;;  %v1603_v26 = vmax.f32 %v1491_v20, 0.0 }
 0x2ef   : > { %v1667_v27 = vmax.f32 %v1604_v14, %v1666_v21  ;;  %v1672_v28 = vrot.slane %v1605_v22, 4 }
 0x2f0   : > { %v1655_v29 = vmax.f32 %v1602_v19, %v1654_v25  ;;  %v1660_v31 = vrot.slane %v1603_v26, 4 }
 0x2f1   : > { %v1668_v32 = vrot.slane %v1667_v27, 2  ;;  %v1673_v33 = vmax.f32 %v1605_v22, %v1672_v28 }
 0x2f2   : > { %v1656_v34 = vrot.slane %v1655_v29, 2  ;;  %v1661_v35 = vmax.f32 %v1603_v26, %v1660_v31 }
 0x2f3   : > { %v1669_v36 = vmax.f32 %v1667_v27, %v1668_v32  ;;  %v1674_v17 = vrot.slane %v1673_v33, 2 }
 0x2f4   : > { %v1657_v18 = vmax.f32 %v1655_v29, %v1656_v34  ;;  %v1662_v37 = vrot.slane %v1661_v35, 2 }
 0x2f5   : > { %v1675_v38 = vmax.f32 %v1673_v33, %v1674_v17  ;;  %v1670_v40 = vrot.slane %v1669_v36, 1 }
 0x2f6   : > { %v1658_v39 = vrot.slane %v1657_v18, 1  ;;  %v1663_v30 = vmax.f32 %v1661_v35, %v1662_v37 }
 0x2f7   : > { %v1676_v42 = vrot.slane %v1675_v38, 1  ;;  %v1671_v44 = vmax.f32 %v1669_v36, %v1670_v40 }
 0x2f8   : > { %v1659_v41 = vmax.f32 %v1657_v18, %v1658_v39  ;;  %v1664_v50 = vrot.slane %v1663_v30, 1 }
 0x2f9   : > { %v1677_v45 = vmax.f32 %v1675_v38, %v1676_v42 }
 0x2fa   : > { %v1861_v43 = vsel %vm1860_vm3, %v1659_v41, %v1859_v5  ;;  %v1665_v23 = vmax.f32 %v1663_v30, %v1664_v50 }
 0x2fc   : > { %v1863_v24 = vsel %vm1862_vm4, %v1665_v23, %v1861_v43 }
 0x2fd   : > { %v1865_v54 = vsel %vm1864_vm5, %v1671_v44, %v1863_v24 }
 0x2fe   : > { %v1867_v3 = vsel %vm1866_vm6, %v1677_v45, %v1865_v54 }
 0x2ff   : > { %1893 = vst [vmem:[%s3007_s14] sm:$0xff] %v1867_v3 }
 0x300   : > { %v2176_v2 = vpop.f32.mrb[8].mxu1 }
 0x301   : > { %v1512_v46 = vadd.f32 %v2176_v2, %v2988_v51  ;;  %v1503_v47 = vpop.f32.mrb[9].mxu1 }
 0x302   : > { %v1504_v11 = vadd.f32 %v2988_v51, %v1503_v47  ;;  %v2177_v48 = vpop.f32.mrb[10].mxu1 }
 0x303   : > { %v1608_v49 = vmax.f32 %v1512_v46, 0.0  ;;  %v1515_v52 = vadd.f32 %v2177_v48, %v2988_v51  ;;  %v1506_v53 = vpop.f32.mrb[11].mxu1 }
 0x304   : > { %v1606_v55 = vmax.f32 %v1504_v11, 0.0  ;;  %v1507_v6 = vadd.f32 %v2988_v51, %v1506_v53 }
 0x305   : > { %v1690_v56 = vrot.slane %v1608_v49, 4  ;;  %v1609_v57 = vmax.f32 %v1515_v52, 0.0 }
 0x306   : > { %v1678_v9 = vrot.slane %v1606_v55, 4  ;;  %v1607_v58 = vmax.f32 %v1507_v6, 0.0 }
 0x307   : > { %v1691_v59 = vmax.f32 %v1608_v49, %v1690_v56  ;;  %v1696_v60 = vrot.slane %v1609_v57, 4 }
 0x308   : > { %v1679_v61 = vmax.f32 %v1606_v55, %v1678_v9  ;;  %v1684_v62 = vrot.slane %v1607_v58, 4 }
 0x309   : > { %v1692_v63 = vrot.slane %v1691_v59, 2  ;;  %v1697_v0 = vmax.f32 %v1609_v57, %v1696_v60 }
 0x30a   : > { %v1680_v1 = vrot.slane %v1679_v61, 2  ;;  %v1685_v4 = vmax.f32 %v1607_v58, %v1684_v62 }
 0x30b   : > { %v1693_v5 = vmax.f32 %v1691_v59, %v1692_v63  ;;  %v1698_v7 = vrot.slane %v1697_v0, 2 }
 0x30c   : > { %v1681_v8 = vmax.f32 %v1679_v61, %v1680_v1  ;;  %v1686_v10 = vrot.slane %v1685_v4, 2 }
 0x30d   : > { %v1699_v12 = vmax.f32 %v1697_v0, %v1698_v7  ;;  %v1694_v15 = vrot.slane %v1693_v5, 1 }
 0x30e   : > { %v1682_v13 = vrot.slane %v1681_v8, 1  ;;  %v1687_v14 = vmax.f32 %v1685_v4, %v1686_v10 }
 0x30f   : > { %v1700_v16 = vrot.slane %v1699_v12, 1  ;;  %v1695_v22 = vmax.f32 %v1693_v5, %v1694_v15 }
 0x310   : > { %v1688_v19 = vrot.slane %v1687_v14, 1  ;;  %v1683_v20 = vmax.f32 %v1681_v8, %v1682_v13 }
 0x311   : > { %v1701_v25 = vmax.f32 %v1699_v12, %v1700_v16 }
 0x312   : > { %v1689_v21 = vmax.f32 %v1687_v14, %v1688_v19 }
 0x314   : > { %v1868_v26 = vsel %vm1854_vm0, %v1689_v21, %v1683_v20 }
 0x315   : > { %v1869_v27 = vsel %vm1856_vm1, %v1695_v22, %v1868_v26 }
 0x316   : > { %v1870_v28 = vsel %vm1858_vm2, %v1701_v25, %v1869_v27 }
 0x318   : > { %v2180_v29 = vpop.f32.mrb[12].mxu1 }
 0x319   : > { %v1528_v31 = vadd.f32 %v2180_v29, %v2988_v51  ;;  %v1519_v32 = vpop.f32.mrb[13].mxu1 }
 0x31a   : > { %v1520_v33 = vadd.f32 %v2988_v51, %v1519_v32  ;;  %v2181_v34 = vpop.f32.mrb[14].mxu1 }
 0x31b   : > { %v1612_v35 = vmax.f32 %v1528_v31, 0.0  ;;  %v1531_v36 = vadd.f32 %v2181_v34, %v2988_v51  ;;  %v1522_v17 = vpop.f32.mrb[15].mxu1 }
 0x31c   : > { %v1610_v18 = vmax.f32 %v1520_v33, 0.0  ;;  %v1523_v37 = vadd.f32 %v2988_v51, %v1522_v17 }
 0x31d   : > { %v1714_v38 = vrot.slane %v1612_v35, 4  ;;  %v1613_v39 = vmax.f32 %v1531_v36, 0.0 }
 0x31e   : > { %v1702_v30 = vrot.slane %v1610_v18, 4  ;;  %v1611_v40 = vmax.f32 %v1523_v37, 0.0 }
 0x31f   : > { %v1715_v41 = vmax.f32 %v1612_v35, %v1714_v38  ;;  %v1720_v42 = vrot.slane %v1613_v39, 4 }
 0x320   : > { %v1703_v50 = vmax.f32 %v1610_v18, %v1702_v30  ;;  %v1708_v43 = vrot.slane %v1611_v40, 4 }
 0x321   : > { %v1716_v23 = vrot.slane %v1715_v41, 2  ;;  %v1721_v44 = vmax.f32 %v1613_v39, %v1720_v42 }
 0x322   : > { %v1704_v45 = vrot.slane %v1703_v50, 2  ;;  %v1709_v24 = vmax.f32 %v1611_v40, %v1708_v43 }
 0x323   : > { %v1717_v54 = vmax.f32 %v1715_v41, %v1716_v23  ;;  %v1722_v3 = vrot.slane %v1721_v44, 2 }
 0x324   : > { %v1705_v2 = vmax.f32 %v1703_v50, %v1704_v45  ;;  %v1710_v46 = vrot.slane %v1709_v24, 2 }
 0x325   : > { %v1723_v47 = vmax.f32 %v1721_v44, %v1722_v3  ;;  %v1718_v49 = vrot.slane %v1717_v54, 1 }
 0x326   : > { %v1706_v11 = vrot.slane %v1705_v2, 1  ;;  %v1711_v48 = vmax.f32 %v1709_v24, %v1710_v46 }
 0x327   : > { %v1724_v53 = vrot.slane %v1723_v47, 1  ;;  %v1719_v57 = vmax.f32 %v1717_v54, %v1718_v49 }
 0x328   : > { %v1707_v52 = vmax.f32 %v1705_v2, %v1706_v11  ;;  %v1712_v55 = vrot.slane %v1711_v48, 1 }
 0x329   : > { %v1725_v9 = vmax.f32 %v1723_v47, %v1724_v53 }
 0x32a   : > { %v1871_v6 = vsel %vm1860_vm3, %v1707_v52, %v1870_v28  ;;  %v1713_v56 = vmax.f32 %v1711_v48, %v1712_v55 }
 0x32c   : > { %v1872_v58 = vsel %vm1862_vm4, %v1713_v56, %v1871_v6 }
 0x32d   : > { %v1873_v59 = vsel %vm1864_vm5, %v1719_v57, %v1872_v58 }
 0x32e   : > { %v1874_v60 = vsel %vm1866_vm6, %v1725_v9, %v1873_v59 }
 0x32f   : > { %1894 = vst [vmem:[%s3007_s14 + $0x8] sm:$0xff] %v1874_v60 }
 0x330   : > { %v2184_v61 = vpop.f32.mrb[16].mxu1 }
 0x331   : > { %v1544_v62 = vadd.f32 %v2184_v61, %v2988_v51  ;;  %v1535_v63 = vpop.f32.mrb[17].mxu1 }
 0x332   : > { %v1536_v0 = vadd.f32 %v2988_v51, %v1535_v63  ;;  %v2185_v1 = vpop.f32.mrb[18].mxu1 }
 0x333   : > { %v1616_v4 = vmax.f32 %v1544_v62, 0.0  ;;  %v1547_v5 = vadd.f32 %v2185_v1, %v2988_v51  ;;  %v1538_v7 = vpop.f32.mrb[19].mxu1 }
 0x334   : > { %v1614_v8 = vmax.f32 %v1536_v0, 0.0  ;;  %v1539_v10 = vadd.f32 %v2988_v51, %v1538_v7 }
 0x335   : > { %v1738_v12 = vrot.slane %v1616_v4, 4  ;;  %v1617_v13 = vmax.f32 %v1547_v5, 0.0 }
 0x336   : > { %v1726_v14 = vrot.slane %v1614_v8, 4  ;;  %v1615_v15 = vmax.f32 %v1539_v10, 0.0 }
 0x337   : > { %v1739_v16 = vmax.f32 %v1616_v4, %v1738_v12  ;;  %v1744_v19 = vrot.slane %v1617_v13, 4 }
 0x338   : > { %v1727_v20 = vmax.f32 %v1614_v8, %v1726_v14  ;;  %v1732_v21 = vrot.slane %v1615_v15, 4 }
 0x339   : > { %v1740_v22 = vrot.slane %v1739_v16, 2  ;;  %v1745_v25 = vmax.f32 %v1617_v13, %v1744_v19 }
 0x33a   : > { %v1728_v26 = vrot.slane %v1727_v20, 2  ;;  %v1733_v27 = vmax.f32 %v1615_v15, %v1732_v21 }
 0x33b   : > { %v1741_v28 = vmax.f32 %v1739_v16, %v1740_v22  ;;  %v1746_v29 = vrot.slane %v1745_v25, 2 }
 0x33c   : > { %v1729_v31 = vmax.f32 %v1727_v20, %v1728_v26  ;;  %v1734_v32 = vrot.slane %v1733_v27, 2 }
 0x33d   : > { %v1747_v33 = vmax.f32 %v1745_v25, %v1746_v29  ;;  %v1742_v36 = vrot.slane %v1741_v28, 1 }
 0x33e   : > { %v1730_v34 = vrot.slane %v1729_v31, 1  ;;  %v1735_v35 = vmax.f32 %v1733_v27, %v1734_v32 }
 0x33f   : > { %v1748_v17 = vrot.slane %v1747_v33, 1  ;;  %v1743_v39 = vmax.f32 %v1741_v28, %v1742_v36 }
 0x340   : > { %v1736_v18 = vrot.slane %v1735_v35, 1  ;;  %v1731_v37 = vmax.f32 %v1729_v31, %v1730_v34 }
 0x341   : > { %v1749_v30 = vmax.f32 %v1747_v33, %v1748_v17 }
 0x342   : > { %v1737_v38 = vmax.f32 %v1735_v35, %v1736_v18 }
 0x344   : > { %v1875_v40 = vsel %vm1854_vm0, %v1737_v38, %v1731_v37 }
 0x345   : > { %v1876_v41 = vsel %vm1856_vm1, %v1743_v39, %v1875_v40 }
 0x346   : > { %v1877_v42 = vsel %vm1858_vm2, %v1749_v30, %v1876_v41 }
 0x348   : > { %v2188_v50 = vpop.f32.mrb[20].mxu1 }
 0x349   : > { %v1560_v43 = vadd.f32 %v2188_v50, %v2988_v51  ;;  %v1551_v23 = vpop.f32.mrb[21].mxu1 }
 0x34a   : > { %v1552_v44 = vadd.f32 %v2988_v51, %v1551_v23  ;;  %v2189_v45 = vpop.f32.mrb[22].mxu1 }
 0x34b   : > { %v1620_v24 = vmax.f32 %v1560_v43, 0.0  ;;  %v1563_v54 = vadd.f32 %v2189_v45, %v2988_v51  ;;  %v1554_v3 = vpop.f32.mrb[23].mxu1 }
 0x34c   : > { %v1618_v2 = vmax.f32 %v1552_v44, 0.0  ;;  %v1555_v46 = vadd.f32 %v2988_v51, %v1554_v3 }
 0x34d   : > { %v1762_v47 = vrot.slane %v1620_v24, 4  ;;  %v1621_v11 = vmax.f32 %v1563_v54, 0.0 }
 0x34e   : > { %v1750_v48 = vrot.slane %v1618_v2, 4  ;;  %v1619_v49 = vmax.f32 %v1555_v46, 0.0 }
 0x34f   : > { %v1763_v52 = vmax.f32 %v1620_v24, %v1762_v47  ;;  %v1768_v53 = vrot.slane %v1621_v11, 4 }
 0x350   : > { %v1751_v55 = vmax.f32 %v1618_v2, %v1750_v48  ;;  %v1756_v6 = vrot.slane %v1619_v49, 4 }
 0x351   : > { %v1764_v56 = vrot.slane %v1763_v52, 2  ;;  %v1769_v57 = vmax.f32 %v1621_v11, %v1768_v53 }
 0x352   : > { %v1752_v9 = vrot.slane %v1751_v55, 2  ;;  %v1757_v58 = vmax.f32 %v1619_v49, %v1756_v6 }
 0x353   : > { %v1765_v59 = vmax.f32 %v1763_v52, %v1764_v56  ;;  %v1770_v60 = vrot.slane %v1769_v57, 2 }
 0x354   : > { %v1753_v61 = vmax.f32 %v1751_v55, %v1752_v9  ;;  %v1758_v62 = vrot.slane %v1757_v58, 2 }
 0x355   : > { %v1771_v63 = vmax.f32 %v1769_v57, %v1770_v60  ;;  %v1766_v4 = vrot.slane %v1765_v59, 1 }
 0x356   : > { %v1754_v0 = vrot.slane %v1753_v61, 1  ;;  %v1759_v1 = vmax.f32 %v1757_v58, %v1758_v62 }
 0x357   : > { %v1772_v7 = vrot.slane %v1771_v63, 1  ;;  %v1767_v13 = vmax.f32 %v1765_v59, %v1766_v4 }
 0x358   : > { %v1755_v5 = vmax.f32 %v1753_v61, %v1754_v0  ;;  %v1760_v8 = vrot.slane %v1759_v1, 1 }
 0x359   : > { %v1773_v14 = vmax.f32 %v1771_v63, %v1772_v7 }
 0x35a   : > { %v1878_v10 = vsel %vm1860_vm3, %v1755_v5, %v1877_v42  ;;  %v1761_v12 = vmax.f32 %v1759_v1, %v1760_v8 }
 0x35c   : > { %v1879_v15 = vsel %vm1862_vm4, %v1761_v12, %v1878_v10 }
 0x35d   : > { %v1880_v16 = vsel %vm1864_vm5, %v1767_v13, %v1879_v15 }
 0x35e   : > { %v1881_v19 = vsel %vm1866_vm6, %v1773_v14, %v1880_v16 }
 0x35f   : > { %1895 = vst [vmem:[%s3007_s14 + $0x10] sm:$0xff] %v1881_v19 }
 0x360   : > { %v2192_v20 = vpop.f32.mrb[24].mxu1 }
 0x361   : > { %v1576_v21 = vadd.f32 %v2192_v20, %v2988_v51  ;;  %v1567_v22 = vpop.f32.mrb[25].mxu1 }
 0x362   : > { %v1568_v25 = vadd.f32 %v2988_v51, %v1567_v22  ;;  %v2193_v26 = vpop.f32.mrb[26].mxu1 }
 0x363   : > { %v1624_v27 = vmax.f32 %v1576_v21, 0.0  ;;  %v1579_v28 = vadd.f32 %v2193_v26, %v2988_v51  ;;  %v1570_v29 = vpop.f32.mrb[27].mxu1 }
 0x364   : > { %v1622_v31 = vmax.f32 %v1568_v25, 0.0  ;;  %v1571_v32 = vadd.f32 %v2988_v51, %v1570_v29 }
 0x365   : > { %v1786_v33 = vrot.slane %v1624_v27, 4  ;;  %v1625_v34 = vmax.f32 %v1579_v28, 0.0 }
 0x366   : > { %v1774_v35 = vrot.slane %v1622_v31, 4  ;;  %v1623_v36 = vmax.f32 %v1571_v32, 0.0 }
 0x367   : > { %v1787_v17 = vmax.f32 %v1624_v27, %v1786_v33  ;;  %v1792_v18 = vrot.slane %v1625_v34, 4 }
 0x368   : > { %v1775_v37 = vmax.f32 %v1622_v31, %v1774_v35  ;;  %v1780_v38 = vrot.slane %v1623_v36, 4 }
 0x369   : > { %v1788_v39 = vrot.slane %v1787_v17, 2  ;;  %v1793_v30 = vmax.f32 %v1625_v34, %v1792_v18 }
 0x36a   : > { %v1776_v40 = vrot.slane %v1775_v37, 2  ;;  %v1781_v41 = vmax.f32 %v1623_v36, %v1780_v38 }
 0x36b   : > { %v1789_v42 = vmax.f32 %v1787_v17, %v1788_v39  ;;  %v1794_v50 = vrot.slane %v1793_v30, 2 }
 0x36c   : > { %v1777_v43 = vmax.f32 %v1775_v37, %v1776_v40  ;;  %v1782_v23 = vrot.slane %v1781_v41, 2 }
 0x36d   : > { %v1795_v44 = vmax.f32 %v1793_v30, %v1794_v50  ;;  %v1790_v54 = vrot.slane %v1789_v42, 1 }
 0x36e   : > { %v1778_v45 = vrot.slane %v1777_v43, 1  ;;  %v1783_v24 = vmax.f32 %v1781_v41, %v1782_v23 }
 0x36f   : > { %v1796_v3 = vrot.slane %v1795_v44, 1  ;;  %v1791_v11 = vmax.f32 %v1789_v42, %v1790_v54 }
 0x370   : > { %v1784_v2 = vrot.slane %v1783_v24, 1  ;;  %v1779_v46 = vmax.f32 %v1777_v43, %v1778_v45 }
 0x371   : > { %v1797_v48 = vmax.f32 %v1795_v44, %v1796_v3 }
 0x372   : > { %v1785_v47 = vmax.f32 %v1783_v24, %v1784_v2 }
 0x374   : > { %v1882_v49 = vsel %vm1854_vm0, %v1785_v47, %v1779_v46 }
 0x375   : > { %v1883_v52 = vsel %vm1856_vm1, %v1791_v11, %v1882_v49 }
 0x376   : > { %v1884_v53 = vsel %vm1858_vm2, %v1797_v48, %v1883_v52 }
 0x378   : > { %v2196_v55 = vpop.f32.mrb[28].mxu1 }
 0x379   : > { %v1592_v6 = vadd.f32 %v2196_v55, %v2988_v51  ;;  %v1583_v56 = vpop.f32.mrb[29].mxu1 }
 0x37a   : > { %v1584_v57 = vadd.f32 %v2988_v51, %v1583_v56  ;;  %v2197_v9 = vpop.f32.mrb[30].mxu1 }
 0x37b   : > { %v1628_v58 = vmax.f32 %v1592_v6, 0.0  ;;  %v1595_v59 = vadd.f32 %v2197_v9, %v2988_v51  ;;  %v1586_v60 = vpop.f32.mrb[31].mxu1 }
 0x37c   : > { %v1626_v61 = vmax.f32 %v1584_v57, 0.0  ;;  %v1587_v62 = vadd.f32 %v2988_v51, %v1586_v60 }
 0x37d   : > { %v1810_v63 = vrot.slane %v1628_v58, 4  ;;  %v1629_v0 = vmax.f32 %v1595_v59, 0.0 }
 0x37e   : > { %v1798_v1 = vrot.slane %v1626_v61, 4  ;;  %v1627_v4 = vmax.f32 %v1587_v62, 0.0 }
 0x37f   : > { %v1811_v5 = vmax.f32 %v1628_v58, %v1810_v63  ;;  %v1816_v7 = vrot.slane %v1629_v0, 4 }
 0x380   : > { %v1799_v8 = vmax.f32 %v1626_v61, %v1798_v1  ;;  %v1804_v10 = vrot.slane %v1627_v4, 4 }
 0x381   : > { %v1812_v12 = vrot.slane %v1811_v5, 2  ;;  %v1817_v13 = vmax.f32 %v1629_v0, %v1816_v7 }
 0x382   : > { %v1800_v14 = vrot.slane %v1799_v8, 2  ;;  %v1805_v15 = vmax.f32 %v1627_v4, %v1804_v10 }
 0x383   : > { %v1813_v16 = vmax.f32 %v1811_v5, %v1812_v12  ;;  %v1818_v19 = vrot.slane %v1817_v13, 2 }
 0x384   : > { %v1801_v20 = vmax.f32 %v1799_v8, %v1800_v14  ;;  %v1806_v21 = vrot.slane %v1805_v15, 2 }
 0x385   : > { %v1819_v22 = vmax.f32 %v1817_v13, %v1818_v19  ;;  %v1814_v26 = vrot.slane %v1813_v16, 1 }
 0x386   : > { %v1802_v51 = vrot.slane %v1801_v20, 1  ;;  %v1807_v25 = vmax.f32 %v1805_v15, %v1806_v21 }
 0x387   : > { %v1820_v28 = vrot.slane %v1819_v22, 1  ;;  %v1815_v33 = vmax.f32 %v1813_v16, %v1814_v26 }
 0x388   : > { %v1803_v27 = vmax.f32 %v1801_v20, %v1802_v51  ;;  %v1808_v29 = vrot.slane %v1807_v25, 1 }
 0x389   : > { %v1821_v34 = vmax.f32 %v1819_v22, %v1820_v28 }
 0x38a   : > { %v1885_v31 = vsel %vm1860_vm3, %v1803_v27, %v1884_v53  ;;  %v1809_v32 = vmax.f32 %v1807_v25, %v1808_v29 }
 0x38c   : > { %v1886_v35 = vsel %vm1862_vm4, %v1809_v32, %v1885_v31 }
 0x38d   : > { %v1887_v36 = vsel %vm1864_vm5, %v1815_v33, %v1886_v35 }
 0x38e   : > { %v1888_v17 = vsel %vm1866_vm6, %v1821_v34, %v1887_v36 }
 0x38f   : > { %1896 = vst [vmem:[%s3007_s14 + $0x18] sm:$0xff] %v1888_v17 }
 0x390   : > { %2424 = shalt.err (!%p2421_p13)
}
 0x391   : > { %s2425_s15 = scalar_lea.hbm %s3060_s21, 512  ;;  %s2429_s14 = scalar_lea.hbm %s3116_s7, 1024 }
 0x392   : > { %p2426_p0 = scmp.ne.s32.totalorder %s3060_s21, %s2425_s15  ;;  %p2430_p9 = scmp.lt.u32.totalorder %s3060_s21, %s3116_s7 }
 0x393   : > { %p2431_p12 = scmp.lt.u32.totalorder %s2429_s14, %s2425_s15  ;;  %p2433_p1 = scmp.lt.u32.totalorder %s2425_s15, %s3060_s21 }
 0x394   : > { %p2427_p5 = pnand %p2426_p0, %p2676_p6 }
 0x395   : > { %p2432_p2 = por %p2431_p12, %p2430_p9 }
 0x396   : > { %p2428_p11 = pneg %p2427_p5 }
 0x397   : > { %p2434_p4 = por %p2433_p1, %p2432_p2 }
 0x399   : > { %p2435_p8 = pnand %p2434_p4, %p2428_p11 }
 0x39b   : > { %2438 = shalt.err (!%p2435_p8)
}
 0x39c   : > { %s2496_s12 = smov 128   ;;  %s2497_s11 = smov 8  }
 0x39d   : > { %2212 = dma.vmem_to_hbm [thread:$0]  (%p2676_p6), %s3062_s18, 512, %s3060_s21, %s1898_s28, %s2496_s12, %s2496_s12, %s2497_s11  }
 0x39e PF: > { %s1926_s30 = sand.u32 1, %s2473_s24   ;;  %p3134_p3 = scmp.ne.s32.totalorder %s3121_s8, 0 }
 0x39f   : > { %p3135_p7 = scmp.ge.s32.totalorder %s2485_s27, 2  ;;  %s1927_s9 = scalar_lea.sflag [#allocation4], %s1926_s30 }
 0x3a1   : > { %p2229_p10 = pnand %p3135_p7, %p3134_p3 }
 0x3a3   : > { %2468 = dma.done.wait (!%p2229_p10), %s1927_s9, 512  }
 0x3a4   : > { %2470 = vsyncadd (!%p2229_p10), %s1927_s9, 4294966784  ;;  %p22_p13 = scmp.ge.s32.totalorder %s2662_s22, 4   ;;  %s3136_s24 = smov %s2477_s25 }
 0x3a5   : > { %s3137_s25 = smov %s2481_s26  ;;  %s3138_s26 = smov %s2672_s19 }
 0x3a6   : > { %s3139_s27 = smov %s2662_s22  ;;  %24 = sbr.rel (!%p22_p13) target bundleno = 7 (0x7), region = 105 }
 0x3ad   :  { %1932 = vsyncpa [#allocation3], 1 }
 0x3ae   :  { %1934 = vsyncpa [#allocation3 + $0x1], 1 }
 0x3af   :  { %1935 = vsyncpa [#allocation6], 1 }
 0x3b0   :  { %1936 = vsyncpa [#allocation9], 1 }
 0x3b1   :  { %1937 = vsyncpa [#allocation4], 1 }
 0x3b2   :  { %1939 = vsyncpa [#allocation4 + $0x1], 1 }

</bundles_post_ra>
